<compile_context>
chip_gen: v6e
topology: v6e:2x2x1
jax: 0.10.0
libtpu: 0.0.40
codegen_flags: <defaults>
</compile_context>

<pallas_src>
import jax
import jax.numpy as jnp
from jax.experimental import pallas as pl
from jax.experimental.pallas import tpu as pltpu


LANE = 128


def _round_up(x, m):
    return ((x + m - 1) // m) * m


def _pad2(a, rows, cols):
    pr, pc = rows - a.shape[0], cols - a.shape[1]
    if pr == 0 and pc == 0:
        return a
    return jnp.pad(a, ((0, pr), (0, pc)))


def _pad1(v, n):
    if v.shape[0] == n:
        return v
    return jnp.pad(v, (0, n - v.shape[0]))


def _tpu_generation():
    try:
        kind = jax.devices()[0].device_kind.lower()
    except Exception:  # pragma: no cover - CPU interpret fallback etc.
        kind = ""
    if "v7" in kind:
        return "v7"
    if "v5" in kind:
        return "v5"
    return "v6"


def actor_forward(rgb_obs, low_dim_obs, std, params):
    B, repr_dim = rgb_obs.shape
    low_dim = low_dim_obs.shape[1]
    feature_dim = params["w_rgb"].shape[1]
    hidden_dim = params["w1"].shape[1]
    action_dim = params["w3"].shape[1]

    f32, bf16 = jnp.float32, jnp.bfloat16
    gen = _tpu_generation()

    R_pad = _round_up(repr_dim, LANE)
    L_pad = _round_up(low_dim, LANE)
    F_pad = _round_up(feature_dim, LANE)
    H_pad = _round_up(hidden_dim, LANE)
    A_pad = _round_up(action_dim, LANE)

    # ---- generation-dependent VMEM budget & batch-tile sizing ----
    if gen == "v7":
        vmem_limit = 48 * 1024 * 1024     # of 64 MiB physical per TC
        tile_b_max = 128
    else:
        vmem_limit = 96 * 1024 * 1024     # v5e / v6e: 128 MiB physical
        tile_b_max = 256

    def _vmem_bytes(tb):
        # weights single-buffered (Buffered(1)), bf16
        w = 2 * (R_pad * F_pad + L_pad * F_pad + 2 * F_pad * H_pad
                 + H_pad * H_pad + H_pad * A_pad)
        aux = 4 * (6 * F_pad + 2 * H_pad + A_pad)
        act_in = 2 * 2 * tb * (R_pad + L_pad)      # double-buffered bf16 inputs
        act_out = 2 * 4 * tb * A_pad               # double-buffered f32 output
        scratch = 2 * tb * 2 * F_pad               # cat scratch (bf16)
        return w + aux + act_in + act_out + scratch

    tile_b = min(tile_b_max, _round_up(B, 8))
    if gen == "v7" and _round_up(B, 8) >= 16:
        # Prefer >=2 grid steps so both v7x TensorCores get a batch tile.
        half = _round_up(pl.cdiv(_round_up(B, 8), 2), 8)
        tile_b = min(tile_b, half)
    while tile_b > 8 and _vmem_bytes(tile_b) > int(0.8 * vmem_limit):
        tile_b = max(8, tile_b // 2)

    nb = pl.cdiv(B, tile_b)
    B_pad = nb * tile_b

    # ---- pad inputs (bf16 activations for the MXU); skip pad if aligned ----
    rgb_pad = _pad2(rgb_obs.astype(f32), B_pad, R_pad).astype(bf16)
    low_pad = _pad2(low_dim_obs.astype(f32), B_pad, L_pad).astype(bf16)

    # ---- pad + cast weights (bf16); pack bias/LN params (f32) ----
    # Padded rows/cols, biases, gamma/beta are zero => padded lanes stay 0.
    w_rgb = _pad2(params["w_rgb"], R_pad, F_pad).astype(bf16)
    w_low = _pad2(params["w_low"], L_pad, F_pad).astype(bf16)
    aux_rgb = jnp.stack([_pad1(params["b_rgb"], F_pad),
                         _pad1(params["g_rgb"], F_pad),
                         _pad1(params["be_rgb"], F_pad)]).astype(f32)
    aux_low = jnp.stack([_pad1(params["b_low"], F_pad),
                         _pad1(params["g_low"], F_pad),
                         _pad1(params["be_low"], F_pad)]).astype(f32)

    w1 = params["w1"]
    # Row-concatenated, per-half zero-padded w1 so one K=2*F_pad matmul on the
    # lane-aligned [rgb_h | low_h] scratch reproduces the original concat.
    w1_cat = jnp.concatenate(
        [_pad2(w1[:feature_dim], F_pad, H_pad),
         _pad2(w1[feature_dim:], F_pad, H_pad)], axis=0).astype(bf16)
    b12 = jnp.stack([_pad1(params["b1"], H_pad),
                     _pad1(params["b2"], H_pad)]).astype(f32)
    w2 = _pad2(params["w2"], H_pad, H_pad).astype(bf16)
    w3 = _pad2(params["w3"], H_pad, A_pad).astype(bf16)
    b3 = _pad1(params["b3"], A_pad).reshape(1, A_pad).astype(f32)

    inv_f = 1.0 / feature_dim  # LayerNorm normalizes over the true width

    def kernel(rgb_ref, low_ref,
               w_rgb_ref, aux_rgb_ref,
               w_low_ref, aux_low_ref,
               w1_ref, b12_ref,
               w2_ref, w3_ref, b3_ref,
               mu_ref, cat_ref):
        def encoder(x_bf16, w_ref, aux_ref):
            # Linear (bf16 x bf16 -> f32 accumulation on the MXU)
            h = jnp.dot(x_bf16, w_ref[...], preferred_element_type=f32)
            h = h + aux_ref[0:1, :]                      # bias (f32)
            # Fused one-pass LayerNorm stats; clamp var at 0 (cancellation).
            s1 = jnp.sum(h, axis=-1, keepdims=True)
            s2 = jnp.sum(h * h, axis=-1, keepdims=True)
            mean = s1 * inv_f
            var = jnp.maximum(s2 * inv_f - mean * mean, 0.0)
            hn = (h - mean) * jax.lax.rsqrt(var + 1e-5)
            hn = hn * aux_ref[1:2, :] + aux_ref[2:3, :]  # gamma / beta
            return jnp.tanh(hn)                          # f32 tanh on the EUP

        rgb_h = encoder(rgb_ref[...], w_rgb_ref, aux_rgb_ref)
        low_h = encoder(low_ref[...], w_low_ref, aux_low_ref)

        # Lane-aligned concat into VMEM scratch (no cross-lane shuffle), then a
        # single K = 2*F_pad matmul (fills the 256-deep MXU on v6e/v7x).
        cat_ref[:, 0:F_pad] = rgb_h.astype(bf16)
        cat_ref[:, F_pad:] = low_h.astype(bf16)

        x = jnp.dot(cat_ref[...], w1_ref[...],
                    preferred_element_type=f32) + b12_ref[0:1, :]
        x = jnp.maximum(x, 0.0)
        x = jnp.dot(x.astype(bf16), w2_ref[...],
                    preferred_element_type=f32) + b12_ref[1:2, :]
        x = jnp.maximum(x, 0.0)
        mu = jnp.dot(x.astype(bf16), w3_ref[...],
                     preferred_element_type=f32) + b3_ref[...]
        mu_ref[...] = jnp.tanh(mu)                       # lane-dense store

    def batch_spec(cols):
        return pl.BlockSpec((tile_b, cols), lambda i: (i, 0))

    def _build(single_buffer_weights):
        def const_spec(rows, cols):
            if single_buffer_weights:
                return pl.BlockSpec((rows, cols), lambda i: (0, 0),
                                    pipeline_mode=pl.Buffered(1))
            return pl.BlockSpec((rows, cols), lambda i: (0, 0))

        return pl.pallas_call(
            kernel,
            out_shape=jax.ShapeDtypeStruct((B_pad, A_pad), f32),
            grid=(nb,),
            in_specs=[
                batch_spec(R_pad),              # rgb
                batch_spec(L_pad),              # low-dim
                const_spec(R_pad, F_pad),       # w_rgb
                const_spec(3, F_pad),           # [b_rgb; gamma_rgb; beta_rgb]
                const_spec(L_pad, F_pad),       # w_low
                const_spec(3, F_pad),           # [b_low; gamma_low; beta_low]
                const_spec(2 * F_pad, H_pad),   # w1 (row-concat of halves)
                const_spec(2, H_pad),           # [b1; b2]
                const_spec(H_pad, H_pad),       # w2
                const_spec(H_pad, A_pad),       # w3
                const_spec(1, A_pad),           # b3
            ],
            out_specs=pl.BlockSpec((tile_b, A_pad), lambda i: (i, 0)),
            scratch_shapes=[pltpu.VMEM((tile_b, 2 * F_pad), bf16)],
            compiler_params=pltpu.CompilerParams(
                dimension_semantics=("parallel",),   # shard batch tiles (v7x)
                vmem_limit_bytes=int(vmem_limit),
            ),
        )

    args = (rgb_pad, low_pad, w_rgb, aux_rgb, w_low, aux_low,
            w1_cat, b12, w2, w3, b3)
    try:
        mu_pad = _build(single_buffer_weights=True)(*args)
    except Exception:
        # Fallback if Buffered(1) is rejected by this Pallas/Mosaic build.
        mu_pad = _build(single_buffer_weights=False)(*args)

    if B_pad == B and A_pad == action_dim:
        mu = mu_pad
    else:
        mu = mu_pad[:B, :action_dim]
    # std is a pure broadcast of a host scalar — no kernel work needed.
    std_out = jnp.full((B, action_dim), std, dtype=f32)
    return mu, std_out


def init_params(key, repr_dim, low_dim, feature_dim, hidden_dim, action_dim):
    ks = jax.random.split(key, 10)

    def lin(kw, kb, fan_in, fan_out):
        # deterministic synthetic init (orthogonal init in the original)
        w = jax.random.normal(kw, (fan_in, fan_out), jnp.float32) / jnp.sqrt(fan_in)
        b = 0.1 * jax.random.normal(kb, (fan_out,), jnp.float32)
        return w, b

    w_rgb, b_rgb = lin(ks[0], ks[1], repr_dim, feature_dim)
    w_low, b_low = lin(ks[2], ks[3], low_dim, feature_dim)
    w1, b1 = lin(ks[4], ks[5], 2 * feature_dim, hidden_dim)
    w2, b2 = lin(ks[6], ks[7], hidden_dim, hidden_dim)
    w3, b3 = lin(ks[8], ks[9], hidden_dim, action_dim)

    return dict(
        w_rgb=w_rgb, b_rgb=b_rgb,
        g_rgb=jnp.ones((feature_dim,), jnp.float32),
        be_rgb=jnp.zeros((feature_dim,), jnp.float32),
        w_low=w_low, b_low=b_low,
        g_low=jnp.ones((feature_dim,), jnp.float32),
        be_low=jnp.zeros((feature_dim,), jnp.float32),
        w1=w1, b1=b1, w2=w2, b2=b2, w3=w3, b3=b3,
    )


def actor_reference_f32(rgb_obs, low_dim_obs, std, p):
    """Pure f32 reference of the PyTorch module semantics."""
    def enc(x, w, b, g, be):
        h = x @ w + b
        m = h.mean(-1, keepdims=True)
        v = ((h - m) ** 2).mean(-1, keepdims=True)
        return jnp.tanh((h - m) / jnp.sqrt(v + 1e-5) * g + be)

    rgb_h = enc(rgb_obs, p["w_rgb"], p["b_rgb"], p["g_rgb"], p["be_rgb"])
    low_h = enc(low_dim_obs, p["w_low"], p["b_low"], p["g_low"], p["be_low"])
    h = jnp.concatenate([rgb_h, low_h], -1)
    x = jnp.maximum(h @ p["w1"] + p["b1"], 0.0)
    x = jnp.maximum(x @ p["w2"] + p["b2"], 0.0)
    mu = jnp.tanh(x @ p["w3"] + p["b3"])
    return mu, jnp.full_like(mu, std)


def actor_reference_bf16(rgb_obs, low_dim_obs, std, p):
    """Reference matching the kernel's numerics (bf16 matmul operands, f32
    accumulation, fused LayerNorm statistics, rsqrt)."""
    bf16 = jnp.bfloat16

    def bdot(a, b):
        return jnp.dot(a.astype(bf16), b.astype(bf16),
                       preferred_element_type=jnp.float32)

    def enc(x, w, b, g, be):
        h = bdot(x, w) + b
        m = jnp.mean(h, -1, keepdims=True)
        v = jnp.maximum(jnp.mean(h * h, -1, keepdims=True) - m * m, 0.0)
        return jnp.tanh((h - m) * jax.lax.rsqrt(v + 1e-5) * g + be)

    F = p["w_rgb"].shape[1]
    rgb_h = enc(rgb_obs, p["w_rgb"], p["b_rgb"], p["g_rgb"], p["be_rgb"])
    low_h = enc(low_dim_obs, p["w_low"], p["b_low"], p["g_low"], p["be_low"])
    x = jnp.maximum(bdot(rgb_h, p["w1"][:F]) + bdot(low_h, p["w1"][F:]) + p["b1"], 0.0)
    x = jnp.maximum(bdot(x, p["w2"]) + p["b2"], 0.0)
    mu = jnp.tanh(bdot(x, p["w3"]) + p["b3"])
    return mu, jnp.full_like(mu, std)


if __name__ == "__main__":
    # Small shapes consistent with the module.
    batch = 4
    repr_dim = 32      # visual encoder feature dim
    low_dim = 16       # low-dimensional obs dim
    feature_dim = 32
    hidden_dim = 32
    action_dim = 6
    std = 0.2

    key = jax.random.PRNGKey(0)
    k_rgb, k_low, k_p = jax.random.split(key, 3)

    rgb_obs = jax.random.normal(k_rgb, (batch, repr_dim), jnp.float32)
    low_dim_obs = jax.random.normal(k_low, (batch, low_dim), jnp.float32)
    params = init_params(k_p, repr_dim, low_dim, feature_dim, hidden_dim, action_dim)

    mu, std_out = actor_forward(rgb_obs, low_dim_obs, std, params)
    jax.block_until_ready((mu, std_out))

    mu_bf16, _ = actor_reference_bf16(rgb_obs, low_dim_obs, std, params)
    mu_f32, std_ref = actor_reference_f32(rgb_obs, low_dim_obs, std, params)

    assert mu.shape == (batch, action_dim)
    assert std_out.shape == (batch, action_dim)
    # Tight check vs a reference using the same bf16-matmul / f32-stats recipe.
    assert jnp.allclose(mu, mu_bf16, atol=5e-3, rtol=5e-3)
    # Looser check vs the full-f32 module semantics (bf16 rounding only).
    assert jnp.allclose(mu, mu_f32, atol=5e-2, rtol=5e-2)
    assert jnp.allclose(std_out, std_ref, atol=1e-6)

    print("KERNEL_OK")
</pallas_src>

<mosaic_0001>
module attributes {stable_mosaic.version = 11 : i64} {
  func.func @kernel(%arg0: i32, %arg1: memref<8x128xbf16, #tpu.memory_space<vmem>>, %arg2: memref<8x128xbf16, #tpu.memory_space<vmem>>, %arg3: memref<128x128xbf16, #tpu.memory_space<vmem>>, %arg4: memref<3x128xf32, #tpu.memory_space<vmem>>, %arg5: memref<128x128xbf16, #tpu.memory_space<vmem>>, %arg6: memref<3x128xf32, #tpu.memory_space<vmem>>, %arg7: memref<256x128xbf16, #tpu.memory_space<vmem>>, %arg8: memref<2x128xf32, #tpu.memory_space<vmem>>, %arg9: memref<128x128xbf16, #tpu.memory_space<vmem>>, %arg10: memref<128x128xbf16, #tpu.memory_space<vmem>>, %arg11: memref<1x128xf32, #tpu.memory_space<vmem>>, %arg12: memref<8x128xf32, #tpu.memory_space<vmem>>, %arg13: memref<8x256xbf16, #tpu.memory_space<vmem>>) attributes {dimension_semantics = [#tpu.dimension_semantics<parallel>], iteration_bounds = array<i64: 1>, scalar_prefetch = 0 : i64, scratch_operands = 1 : i64, tpu.core_type = #tpu.core_type<tc>, window_params = [{transform_indices = @transform_0, window_bounds = array<i64: 8, 128>}, {transform_indices = @transform_1, window_bounds = array<i64: 8, 128>}, {pipeline_mode = #tpu.pipeline_mode<synchronous>, transform_indices = @transform_2, window_bounds = array<i64: 128, 128>}, {pipeline_mode = #tpu.pipeline_mode<synchronous>, transform_indices = @transform_3, window_bounds = array<i64: 3, 128>}, {pipeline_mode = #tpu.pipeline_mode<synchronous>, transform_indices = @transform_4, window_bounds = array<i64: 128, 128>}, {pipeline_mode = #tpu.pipeline_mode<synchronous>, transform_indices = @transform_5, window_bounds = array<i64: 3, 128>}, {pipeline_mode = #tpu.pipeline_mode<synchronous>, transform_indices = @transform_6, window_bounds = array<i64: 256, 128>}, {pipeline_mode = #tpu.pipeline_mode<synchronous>, transform_indices = @transform_7, window_bounds = array<i64: 2, 128>}, {pipeline_mode = #tpu.pipeline_mode<synchronous>, transform_indices = @transform_8, window_bounds = array<i64: 128, 128>}, {pipeline_mode = #tpu.pipeline_mode<synchronous>, transform_indices = @transform_9, window_bounds = array<i64: 128, 128>}, {pipeline_mode = #tpu.pipeline_mode<synchronous>, transform_indices = @transform_10, window_bounds = array<i64: 1, 128>}, {transform_indices = @transform_11, window_bounds = array<i64: 8, 128>}]} {
    %c0 = arith.constant 0 : index
    %c0_0 = arith.constant 0 : index
    %0 = vector.load %arg1[%c0, %c0_0] : memref<8x128xbf16, #tpu.memory_space<vmem>>, vector<8x128xbf16>
    %c0_1 = arith.constant 0 : index
    %c0_2 = arith.constant 0 : index
    %1 = vector.load %arg3[%c0_1, %c0_2] : memref<128x128xbf16, #tpu.memory_space<vmem>>, vector<128x128xbf16>
    %cst = arith.constant dense<0.000000e+00> : vector<8x128xf32>
    %2 = tpu.matmul %0, %1, %cst {dimension_numbers = #tpu.dot_dimension_numbers<[1], [0], [0], [1], [0, 0, 1, 1], [], []>} : vector<8x128xbf16>, vector<128x128xbf16>, vector<8x128xf32> -> vector<8x128xf32>
    %c0_3 = arith.constant 0 : index
    %c0_4 = arith.constant 0 : index
    %3 = vector.load %arg4[%c0_3, %c0_4] : memref<3x128xf32, #tpu.memory_space<vmem>>, vector<1x128xf32>
    %4 = vector.broadcast %3 : vector<1x128xf32> to vector<8x128xf32>
    %5 = arith.addf %2, %4 : vector<8x128xf32>
    %cst_5 = arith.constant dense<0.000000e+00> : vector<8xf32>
    %6 = vector.multi_reduction <add>, %5, %cst_5 [1] : vector<8x128xf32> to vector<8xf32>
    %7 = vector.shape_cast %6 : vector<8xf32> to vector<8x1xf32>
    %8 = arith.mulf %5, %5 : vector<8x128xf32>
    %cst_6 = arith.constant dense<0.000000e+00> : vector<8xf32>
    %9 = vector.multi_reduction <add>, %8, %cst_6 [1] : vector<8x128xf32> to vector<8xf32>
    %10 = vector.shape_cast %9 : vector<8xf32> to vector<8x1xf32>
    %cst_7 = arith.constant 3.125000e-02 : f32
    %11 = vector.broadcast %cst_7 : f32 to vector<8x1xf32>
    %12 = arith.mulf %7, %11 : vector<8x1xf32>
    %cst_8 = arith.constant 3.125000e-02 : f32
    %13 = vector.broadcast %cst_8 : f32 to vector<8x1xf32>
    %14 = arith.mulf %10, %13 : vector<8x1xf32>
    %15 = arith.mulf %12, %12 : vector<8x1xf32>
    %16 = arith.subf %14, %15 : vector<8x1xf32>
    %cst_9 = arith.constant 0.000000e+00 : f32
    %17 = vector.broadcast %cst_9 : f32 to vector<8x1xf32>
    %18 = arith.maximumf %16, %17 : vector<8x1xf32>
    %19 = vector.broadcast %12 : vector<8x1xf32> to vector<8x128xf32>
    %20 = arith.subf %5, %19 : vector<8x128xf32>
    %cst_10 = arith.constant 9.99999974E-6 : f32
    %21 = vector.broadcast %cst_10 : f32 to vector<8x1xf32>
    %22 = arith.addf %18, %21 : vector<8x1xf32>
    %23 = math.rsqrt %22 : vector<8x1xf32>
    %24 = vector.broadcast %23 : vector<8x1xf32> to vector<8x128xf32>
    %25 = arith.mulf %20, %24 : vector<8x128xf32>
    %c1 = arith.constant 1 : index
    %c0_11 = arith.constant 0 : index
    %26 = vector.load %arg4[%c1, %c0_11] : memref<3x128xf32, #tpu.memory_space<vmem>>, vector<1x128xf32>
    %27 = vector.broadcast %26 : vector<1x128xf32> to vector<8x128xf32>
    %28 = arith.mulf %25, %27 : vector<8x128xf32>
    %c2 = arith.constant 2 : index
    %c0_12 = arith.constant 0 : index
    %29 = vector.load %arg4[%c2, %c0_12] : memref<3x128xf32, #tpu.memory_space<vmem>>, vector<1x128xf32>
    %30 = vector.broadcast %29 : vector<1x128xf32> to vector<8x128xf32>
    %31 = arith.addf %28, %30 : vector<8x128xf32>
    %32 = math.tanh %31 : vector<8x128xf32>
    %c0_13 = arith.constant 0 : index
    %c0_14 = arith.constant 0 : index
    %33 = vector.load %arg2[%c0_13, %c0_14] : memref<8x128xbf16, #tpu.memory_space<vmem>>, vector<8x128xbf16>
    %c0_15 = arith.constant 0 : index
    %c0_16 = arith.constant 0 : index
    %34 = vector.load %arg5[%c0_15, %c0_16] : memref<128x128xbf16, #tpu.memory_space<vmem>>, vector<128x128xbf16>
    %cst_17 = arith.constant dense<0.000000e+00> : vector<8x128xf32>
    %35 = tpu.matmul %33, %34, %cst_17 {dimension_numbers = #tpu.dot_dimension_numbers<[1], [0], [0], [1], [0, 0, 1, 1], [], []>} : vector<8x128xbf16>, vector<128x128xbf16>, vector<8x128xf32> -> vector<8x128xf32>
    %c0_18 = arith.constant 0 : index
    %c0_19 = arith.constant 0 : index
    %36 = vector.load %arg6[%c0_18, %c0_19] : memref<3x128xf32, #tpu.memory_space<vmem>>, vector<1x128xf32>
    %37 = vector.broadcast %36 : vector<1x128xf32> to vector<8x128xf32>
    %38 = arith.addf %35, %37 : vector<8x128xf32>
    %cst_20 = arith.constant dense<0.000000e+00> : vector<8xf32>
    %39 = vector.multi_reduction <add>, %38, %cst_20 [1] : vector<8x128xf32> to vector<8xf32>
    %40 = vector.shape_cast %39 : vector<8xf32> to vector<8x1xf32>
    %41 = arith.mulf %38, %38 : vector<8x128xf32>
    %cst_21 = arith.constant dense<0.000000e+00> : vector<8xf32>
    %42 = vector.multi_reduction <add>, %41, %cst_21 [1] : vector<8x128xf32> to vector<8xf32>
    %43 = vector.shape_cast %42 : vector<8xf32> to vector<8x1xf32>
    %cst_22 = arith.constant 3.125000e-02 : f32
    %44 = vector.broadcast %cst_22 : f32 to vector<8x1xf32>
    %45 = arith.mulf %40, %44 : vector<8x1xf32>
    %cst_23 = arith.constant 3.125000e-02 : f32
    %46 = vector.broadcast %cst_23 : f32 to vector<8x1xf32>
    %47 = arith.mulf %43, %46 : vector<8x1xf32>
    %48 = arith.mulf %45, %45 : vector<8x1xf32>
    %49 = arith.subf %47, %48 : vector<8x1xf32>
    %cst_24 = arith.constant 0.000000e+00 : f32
    %50 = vector.broadcast %cst_24 : f32 to vector<8x1xf32>
    %51 = arith.maximumf %49, %50 : vector<8x1xf32>
    %52 = vector.broadcast %45 : vector<8x1xf32> to vector<8x128xf32>
    %53 = arith.subf %38, %52 : vector<8x128xf32>
    %cst_25 = arith.constant 9.99999974E-6 : f32
    %54 = vector.broadcast %cst_25 : f32 to vector<8x1xf32>
    %55 = arith.addf %51, %54 : vector<8x1xf32>
    %56 = math.rsqrt %55 : vector<8x1xf32>
    %57 = vector.broadcast %56 : vector<8x1xf32> to vector<8x128xf32>
    %58 = arith.mulf %53, %57 : vector<8x128xf32>
    %c1_26 = arith.constant 1 : index
    %c0_27 = arith.constant 0 : index
    %59 = vector.load %arg6[%c1_26, %c0_27] : memref<3x128xf32, #tpu.memory_space<vmem>>, vector<1x128xf32>
    %60 = vector.broadcast %59 : vector<1x128xf32> to vector<8x128xf32>
    %61 = arith.mulf %58, %60 : vector<8x128xf32>
    %c2_28 = arith.constant 2 : index
    %c0_29 = arith.constant 0 : index
    %62 = vector.load %arg6[%c2_28, %c0_29] : memref<3x128xf32, #tpu.memory_space<vmem>>, vector<1x128xf32>
    %63 = vector.broadcast %62 : vector<1x128xf32> to vector<8x128xf32>
    %64 = arith.addf %61, %63 : vector<8x128xf32>
    %65 = math.tanh %64 : vector<8x128xf32>
    %66 = arith.truncf %32 : vector<8x128xf32> to vector<8x128xbf16>
    %c0_30 = arith.constant 0 : index
    %c0_31 = arith.constant 0 : index
    %67 = vector.load %arg13[%c0_30, %c0_31] : memref<8x256xbf16, #tpu.memory_space<vmem>>, vector<8x128xbf16>
    tpu.vector_store %arg13[%c0_30, %c0_31], %66 {strides = array<i32>} : memref<8x256xbf16, #tpu.memory_space<vmem>>, vector<8x128xbf16>,
    %68 = arith.truncf %65 : vector<8x128xf32> to vector<8x128xbf16>
    %c0_32 = arith.constant 0 : index
    %c128 = arith.constant 128 : index
    %69 = vector.load %arg13[%c0_32, %c128] : memref<8x256xbf16, #tpu.memory_space<vmem>>, vector<8x128xbf16>
    tpu.vector_store %arg13[%c0_32, %c128], %68 {strides = array<i32>} : memref<8x256xbf16, #tpu.memory_space<vmem>>, vector<8x128xbf16>,
    %c0_33 = arith.constant 0 : index
    %c0_34 = arith.constant 0 : index
    %70 = vector.load %arg13[%c0_33, %c0_34] : memref<8x256xbf16, #tpu.memory_space<vmem>>, vector<8x256xbf16>
    %c0_35 = arith.constant 0 : index
    %c0_36 = arith.constant 0 : index
    %71 = vector.load %arg7[%c0_35, %c0_36] : memref<256x128xbf16, #tpu.memory_space<vmem>>, vector<256x128xbf16>
    %cst_37 = arith.constant dense<0.000000e+00> : vector<8x128xf32>
    %72 = tpu.matmul %70, %71, %cst_37 {dimension_numbers = #tpu.dot_dimension_numbers<[1], [0], [0], [1], [0, 0, 1, 1], [], []>} : vector<8x256xbf16>, vector<256x128xbf16>, vector<8x128xf32> -> vector<8x128xf32>
    %c0_38 = arith.constant 0 : index
    %c0_39 = arith.constant 0 : index
    %73 = vector.load %arg8[%c0_38, %c0_39] : memref<2x128xf32, #tpu.memory_space<vmem>>, vector<1x128xf32>
    %74 = vector.broadcast %73 : vector<1x128xf32> to vector<8x128xf32>
    %75 = arith.addf %72, %74 : vector<8x128xf32>
    %cst_40 = arith.constant 0.000000e+00 : f32
    %76 = vector.broadcast %cst_40 : f32 to vector<8x128xf32>
    %77 = arith.maximumf %75, %76 : vector<8x128xf32>
    %78 = arith.truncf %77 : vector<8x128xf32> to vector<8x128xbf16>
    %c0_41 = arith.constant 0 : index
    %c0_42 = arith.constant 0 : index
    %79 = vector.load %arg9[%c0_41, %c0_42] : memref<128x128xbf16, #tpu.memory_space<vmem>>, vector<128x128xbf16>
    %cst_43 = arith.constant dense<0.000000e+00> : vector<8x128xf32>
    %80 = tpu.matmul %78, %79, %cst_43 {dimension_numbers = #tpu.dot_dimension_numbers<[1], [0], [0], [1], [0, 0, 1, 1], [], []>} : vector<8x128xbf16>, vector<128x128xbf16>, vector<8x128xf32> -> vector<8x128xf32>
    %c1_44 = arith.constant 1 : index
    %c0_45 = arith.constant 0 : index
    %81 = vector.load %arg8[%c1_44, %c0_45] : memref<2x128xf32, #tpu.memory_space<vmem>>, vector<1x128xf32>
    %82 = vector.broadcast %81 : vector<1x128xf32> to vector<8x128xf32>
    %83 = arith.addf %80, %82 : vector<8x128xf32>
    %cst_46 = arith.constant 0.000000e+00 : f32
    %84 = vector.broadcast %cst_46 : f32 to vector<8x128xf32>
    %85 = arith.maximumf %83, %84 : vector<8x128xf32>
    %86 = arith.truncf %85 : vector<8x128xf32> to vector<8x128xbf16>
    %c0_47 = arith.constant 0 : index
    %c0_48 = arith.constant 0 : index
    %87 = vector.load %arg10[%c0_47, %c0_48] : memref<128x128xbf16, #tpu.memory_space<vmem>>, vector<128x128xbf16>
    %cst_49 = arith.constant dense<0.000000e+00> : vector<8x128xf32>
    %88 = tpu.matmul %86, %87, %cst_49 {dimension_numbers = #tpu.dot_dimension_numbers<[1], [0], [0], [1], [0, 0, 1, 1], [], []>} : vector<8x128xbf16>, vector<128x128xbf16>, vector<8x128xf32> -> vector<8x128xf32>
    %c0_50 = arith.constant 0 : index
    %c0_51 = arith.constant 0 : index
    %89 = vector.load %arg11[%c0_50, %c0_51] : memref<1x128xf32, #tpu.memory_space<vmem>>, vector<1x128xf32>
    %90 = vector.broadcast %89 : vector<1x128xf32> to vector<8x128xf32>
    %91 = arith.addf %88, %90 : vector<8x128xf32>
    %92 = math.tanh %91 : vector<8x128xf32>
    %c0_52 = arith.constant 0 : index
    %c0_53 = arith.constant 0 : index
    %93 = vector.load %arg12[%c0_52, %c0_53] : memref<8x128xf32, #tpu.memory_space<vmem>>, vector<8x128xf32>
    tpu.vector_store %arg12[%c0_52, %c0_53], %92 {strides = array<i32>} : memref<8x128xf32, #tpu.memory_space<vmem>>, vector<8x128xf32>,
    return
  }
  func.func @transform_0(%arg0: i32) -> (i32, i32) {
    %c0_i32 = arith.constant 0 : i32
    %c0_i32_0 = arith.constant 0 : i32
    return %arg0, %c0_i32 : i32, i32
  }
  func.func @transform_1(%arg0: i32) -> (i32, i32) {
    %c0_i32 = arith.constant 0 : i32
    %c0_i32_0 = arith.constant 0 : i32
    return %arg0, %c0_i32 : i32, i32
  }
  func.func @transform_2(%arg0: i32) -> (i32, i32) {
    %c0_i32 = arith.constant 0 : i32
    %c0_i32_0 = arith.constant 0 : i32
    %c0_i32_1 = arith.constant 0 : i32
    return %c0_i32, %c0_i32_0 : i32, i32
  }
  func.func @transform_3(%arg0: i32) -> (i32, i32) {
    %c0_i32 = arith.constant 0 : i32
    %c0_i32_0 = arith.constant 0 : i32
    %c0_i32_1 = arith.constant 0 : i32
    return %c0_i32, %c0_i32_0 : i32, i32
  }
  func.func @transform_4(%arg0: i32) -> (i32, i32) {
    %c0_i32 = arith.constant 0 : i32
    %c0_i32_0 = arith.constant 0 : i32
    %c0_i32_1 = arith.constant 0 : i32
    return %c0_i32, %c0_i32_0 : i32, i32
  }
  func.func @transform_5(%arg0: i32) -> (i32, i32) {
    %c0_i32 = arith.constant 0 : i32
    %c0_i32_0 = arith.constant 0 : i32
    %c0_i32_1 = arith.constant 0 : i32
    return %c0_i32, %c0_i32_0 : i32, i32
  }
  func.func @transform_6(%arg0: i32) -> (i32, i32) {
    %c0_i32 = arith.constant 0 : i32
    %c0_i32_0 = arith.constant 0 : i32
    %c0_i32_1 = arith.constant 0 : i32
    return %c0_i32, %c0_i32_0 : i32, i32
  }
  func.func @transform_7(%arg0: i32) -> (i32, i32) {
    %c0_i32 = arith.constant 0 : i32
    %c0_i32_0 = arith.constant 0 : i32
    %c0_i32_1 = arith.constant 0 : i32
    return %c0_i32, %c0_i32_0 : i32, i32
  }
  func.func @transform_8(%arg0: i32) -> (i32, i32) {
    %c0_i32 = arith.constant 0 : i32
    %c0_i32_0 = arith.constant 0 : i32
    %c0_i32_1 = arith.constant 0 : i32
    return %c0_i32, %c0_i32_0 : i32, i32
  }
  func.func @transform_9(%arg0: i32) -> (i32, i32) {
    %c0_i32 = arith.constant 0 : i32
    %c0_i32_0 = arith.constant 0 : i32
    %c0_i32_1 = arith.constant 0 : i32
    return %c0_i32, %c0_i32_0 : i32, i32
  }
  func.func @transform_10(%arg0: i32) -> (i32, i32) {
    %c0_i32 = arith.constant 0 : i32
    %c0_i32_0 = arith.constant 0 : i32
    %c0_i32_1 = arith.constant 0 : i32
    return %c0_i32, %c0_i32_0 : i32, i32
  }
  func.func @transform_11(%arg0: i32) -> (i32, i32) {
    %c0_i32 = arith.constant 0 : i32
    %c0_i32_0 = arith.constant 0 : i32
    return %arg0, %c0_i32 : i32, i32
  }
}

module attributes {stable_mosaic.version = 11 : i64} {
  func.func @kernel(%arg0: i32, %arg1: memref<8x128xbf16, #tpu.memory_space<vmem>>, %arg2: memref<8x128xbf16, #tpu.memory_space<vmem>>, %arg3: memref<128x128xbf16, #tpu.memory_space<vmem>>, %arg4: memref<3x128xf32, #tpu.memory_space<vmem>>, %arg5: memref<128x128xbf16, #tpu.memory_space<vmem>>, %arg6: memref<3x128xf32, #tpu.memory_space<vmem>>, %arg7: memref<256x128xbf16, #tpu.memory_space<vmem>>, %arg8: memref<2x128xf32, #tpu.memory_space<vmem>>, %arg9: memref<128x128xbf16, #tpu.memory_space<vmem>>, %arg10: memref<128x128xbf16, #tpu.memory_space<vmem>>, %arg11: memref<1x128xf32, #tpu.memory_space<vmem>>, %arg12: memref<8x128xf32, #tpu.memory_space<vmem>>, %arg13: memref<8x256xbf16, #tpu.memory_space<vmem>>) attributes {dimension_semantics = [#tpu.dimension_semantics<parallel>], iteration_bounds = array<i64: 1>, scalar_prefetch = 0 : i64, scratch_operands = 1 : i64, tpu.core_type = #tpu.core_type<tc>, window_params = [{transform_indices = @transform_0, window_bounds = array<i64: 8, 128>}, {transform_indices = @transform_1, window_bounds = array<i64: 8, 128>}, {pipeline_mode = #tpu.pipeline_mode<synchronous>, transform_indices = @transform_2, window_bounds = array<i64: 128, 128>}, {pipeline_mode = #tpu.pipeline_mode<synchronous>, transform_indices = @transform_3, window_bounds = array<i64: 3, 128>}, {pipeline_mode = #tpu.pipeline_mode<synchronous>, transform_indices = @transform_4, window_bounds = array<i64: 128, 128>}, {pipeline_mode = #tpu.pipeline_mode<synchronous>, transform_indices = @transform_5, window_bounds = array<i64: 3, 128>}, {pipeline_mode = #tpu.pipeline_mode<synchronous>, transform_indices = @transform_6, window_bounds = array<i64: 256, 128>}, {pipeline_mode = #tpu.pipeline_mode<synchronous>, transform_indices = @transform_7, window_bounds = array<i64: 2, 128>}, {pipeline_mode = #tpu.pipeline_mode<synchronous>, transform_indices = @transform_8, window_bounds = array<i64: 128, 128>}, {pipeline_mode = #tpu.pipeline_mode<synchronous>, transform_indices = @transform_9, window_bounds = array<i64: 128, 128>}, {pipeline_mode = #tpu.pipeline_mode<synchronous>, transform_indices = @transform_10, window_bounds = array<i64: 1, 128>}, {transform_indices = @transform_11, window_bounds = array<i64: 8, 128>}]} {
    %c0 = arith.constant 0 : index
    %c0_0 = arith.constant 0 : index
    %0 = vector.load %arg1[%c0, %c0_0] : memref<8x128xbf16, #tpu.memory_space<vmem>>, vector<8x128xbf16>
    %c0_1 = arith.constant 0 : index
    %c0_2 = arith.constant 0 : index
    %1 = vector.load %arg3[%c0_1, %c0_2] : memref<128x128xbf16, #tpu.memory_space<vmem>>, vector<128x128xbf16>
    %cst = arith.constant dense<0.000000e+00> : vector<8x128xf32>
    %2 = tpu.matmul %0, %1, %cst {dimension_numbers = #tpu.dot_dimension_numbers<[1], [0], [0], [1], [0, 0, 1, 1], [], []>} : vector<8x128xbf16>, vector<128x128xbf16>, vector<8x128xf32> -> vector<8x128xf32>
    %c0_3 = arith.constant 0 : index
    %c0_4 = arith.constant 0 : index
    %3 = vector.load %arg4[%c0_3, %c0_4] : memref<3x128xf32, #tpu.memory_space<vmem>>, vector<1x128xf32>
    %4 = vector.broadcast %3 : vector<1x128xf32> to vector<8x128xf32>
    %5 = arith.addf %2, %4 : vector<8x128xf32>
    %cst_5 = arith.constant dense<0.000000e+00> : vector<8xf32>
    %6 = vector.multi_reduction <add>, %5, %cst_5 [1] : vector<8x128xf32> to vector<8xf32>
    %7 = vector.shape_cast %6 : vector<8xf32> to vector<8x1xf32>
    %8 = arith.mulf %5, %5 : vector<8x128xf32>
    %cst_6 = arith.constant dense<0.000000e+00> : vector<8xf32>
    %9 = vector.multi_reduction <add>, %8, %cst_6 [1] : vector<8x128xf32> to vector<8xf32>
    %10 = vector.shape_cast %9 : vector<8xf32> to vector<8x1xf32>
    %cst_7 = arith.constant 3.125000e-02 : f32
    %11 = vector.broadcast %cst_7 : f32 to vector<8x1xf32>
    %12 = arith.mulf %7, %11 : vector<8x1xf32>
    %cst_8 = arith.constant 3.125000e-02 : f32
    %13 = vector.broadcast %cst_8 : f32 to vector<8x1xf32>
    %14 = arith.mulf %10, %13 : vector<8x1xf32>
    %15 = arith.mulf %12, %12 : vector<8x1xf32>
    %16 = arith.subf %14, %15 : vector<8x1xf32>
    %cst_9 = arith.constant 0.000000e+00 : f32
    %17 = vector.broadcast %cst_9 : f32 to vector<8x1xf32>
    %18 = arith.maximumf %16, %17 : vector<8x1xf32>
    %19 = vector.broadcast %12 : vector<8x1xf32> to vector<8x128xf32>
    %20 = arith.subf %5, %19 : vector<8x128xf32>
    %cst_10 = arith.constant 9.99999974E-6 : f32
    %21 = vector.broadcast %cst_10 : f32 to vector<8x1xf32>
    %22 = arith.addf %18, %21 : vector<8x1xf32>
    %23 = math.rsqrt %22 : vector<8x1xf32>
    %24 = vector.broadcast %23 : vector<8x1xf32> to vector<8x128xf32>
    %25 = arith.mulf %20, %24 : vector<8x128xf32>
    %c1 = arith.constant 1 : index
    %c0_11 = arith.constant 0 : index
    %26 = vector.load %arg4[%c1, %c0_11] : memref<3x128xf32, #tpu.memory_space<vmem>>, vector<1x128xf32>
    %27 = vector.broadcast %26 : vector<1x128xf32> to vector<8x128xf32>
    %28 = arith.mulf %25, %27 : vector<8x128xf32>
    %c2 = arith.constant 2 : index
    %c0_12 = arith.constant 0 : index
    %29 = vector.load %arg4[%c2, %c0_12] : memref<3x128xf32, #tpu.memory_space<vmem>>, vector<1x128xf32>
    %30 = vector.broadcast %29 : vector<1x128xf32> to vector<8x128xf32>
    %31 = arith.addf %28, %30 : vector<8x128xf32>
    %32 = math.tanh %31 : vector<8x128xf32>
    %c0_13 = arith.constant 0 : index
    %c0_14 = arith.constant 0 : index
    %33 = vector.load %arg2[%c0_13, %c0_14] : memref<8x128xbf16, #tpu.memory_space<vmem>>, vector<8x128xbf16>
    %c0_15 = arith.constant 0 : index
    %c0_16 = arith.constant 0 : index
    %34 = vector.load %arg5[%c0_15, %c0_16] : memref<128x128xbf16, #tpu.memory_space<vmem>>, vector<128x128xbf16>
    %cst_17 = arith.constant dense<0.000000e+00> : vector<8x128xf32>
    %35 = tpu.matmul %33, %34, %cst_17 {dimension_numbers = #tpu.dot_dimension_numbers<[1], [0], [0], [1], [0, 0, 1, 1], [], []>} : vector<8x128xbf16>, vector<128x128xbf16>, vector<8x128xf32> -> vector<8x128xf32>
    %c0_18 = arith.constant 0 : index
    %c0_19 = arith.constant 0 : index
    %36 = vector.load %arg6[%c0_18, %c0_19] : memref<3x128xf32, #tpu.memory_space<vmem>>, vector<1x128xf32>
    %37 = vector.broadcast %36 : vector<1x128xf32> to vector<8x128xf32>
    %38 = arith.addf %35, %37 : vector<8x128xf32>
    %cst_20 = arith.constant dense<0.000000e+00> : vector<8xf32>
    %39 = vector.multi_reduction <add>, %38, %cst_20 [1] : vector<8x128xf32> to vector<8xf32>
    %40 = vector.shape_cast %39 : vector<8xf32> to vector<8x1xf32>
    %41 = arith.mulf %38, %38 : vector<8x128xf32>
    %cst_21 = arith.constant dense<0.000000e+00> : vector<8xf32>
    %42 = vector.multi_reduction <add>, %41, %cst_21 [1] : vector<8x128xf32> to vector<8xf32>
    %43 = vector.shape_cast %42 : vector<8xf32> to vector<8x1xf32>
    %cst_22 = arith.constant 3.125000e-02 : f32
    %44 = vector.broadcast %cst_22 : f32 to vector<8x1xf32>
    %45 = arith.mulf %40, %44 : vector<8x1xf32>
    %cst_23 = arith.constant 3.125000e-02 : f32
    %46 = vector.broadcast %cst_23 : f32 to vector<8x1xf32>
    %47 = arith.mulf %43, %46 : vector<8x1xf32>
    %48 = arith.mulf %45, %45 : vector<8x1xf32>
    %49 = arith.subf %47, %48 : vector<8x1xf32>
    %cst_24 = arith.constant 0.000000e+00 : f32
    %50 = vector.broadcast %cst_24 : f32 to vector<8x1xf32>
    %51 = arith.maximumf %49, %50 : vector<8x1xf32>
    %52 = vector.broadcast %45 : vector<8x1xf32> to vector<8x128xf32>
    %53 = arith.subf %38, %52 : vector<8x128xf32>
    %cst_25 = arith.constant 9.99999974E-6 : f32
    %54 = vector.broadcast %cst_25 : f32 to vector<8x1xf32>
    %55 = arith.addf %51, %54 : vector<8x1xf32>
    %56 = math.rsqrt %55 : vector<8x1xf32>
    %57 = vector.broadcast %56 : vector<8x1xf32> to vector<8x128xf32>
    %58 = arith.mulf %53, %57 : vector<8x128xf32>
    %c1_26 = arith.constant 1 : index
    %c0_27 = arith.constant 0 : index
    %59 = vector.load %arg6[%c1_26, %c0_27] : memref<3x128xf32, #tpu.memory_space<vmem>>, vector<1x128xf32>
    %60 = vector.broadcast %59 : vector<1x128xf32> to vector<8x128xf32>
    %61 = arith.mulf %58, %60 : vector<8x128xf32>
    %c2_28 = arith.constant 2 : index
    %c0_29 = arith.constant 0 : index
    %62 = vector.load %arg6[%c2_28, %c0_29] : memref<3x128xf32, #tpu.memory_space<vmem>>, vector<1x128xf32>
    %63 = vector.broadcast %62 : vector<1x128xf32> to vector<8x128xf32>
    %64 = arith.addf %61, %63 : vector<8x128xf32>
    %65 = math.tanh %64 : vector<8x128xf32>
    %66 = arith.truncf %32 : vector<8x128xf32> to vector<8x128xbf16>
    %c0_30 = arith.constant 0 : index
    %c0_31 = arith.constant 0 : index
    %67 = vector.load %arg13[%c0_30, %c0_31] : memref<8x256xbf16, #tpu.memory_space<vmem>>, vector<8x128xbf16>
    tpu.vector_store %arg13[%c0_30, %c0_31], %66 {strides = array<i32>} : memref<8x256xbf16, #tpu.memory_space<vmem>>, vector<8x128xbf16>,
    %68 = arith.truncf %65 : vector<8x128xf32> to vector<8x128xbf16>
    %c0_32 = arith.constant 0 : index
    %c128 = arith.constant 128 : index
    %69 = vector.load %arg13[%c0_32, %c128] : memref<8x256xbf16, #tpu.memory_space<vmem>>, vector<8x128xbf16>
    tpu.vector_store %arg13[%c0_32, %c128], %68 {strides = array<i32>} : memref<8x256xbf16, #tpu.memory_space<vmem>>, vector<8x128xbf16>,
    %c0_33 = arith.constant 0 : index
    %c0_34 = arith.constant 0 : index
    %70 = vector.load %arg13[%c0_33, %c0_34] : memref<8x256xbf16, #tpu.memory_space<vmem>>, vector<8x256xbf16>
    %c0_35 = arith.constant 0 : index
    %c0_36 = arith.constant 0 : index
    %71 = vector.load %arg7[%c0_35, %c0_36] : memref<256x128xbf16, #tpu.memory_space<vmem>>, vector<256x128xbf16>
    %cst_37 = arith.constant dense<0.000000e+00> : vector<8x128xf32>
    %72 = tpu.matmul %70, %71, %cst_37 {dimension_numbers = #tpu.dot_dimension_numbers<[1], [0], [0], [1], [0, 0, 1, 1], [], []>} : vector<8x256xbf16>, vector<256x128xbf16>, vector<8x128xf32> -> vector<8x128xf32>
    %c0_38 = arith.constant 0 : index
    %c0_39 = arith.constant 0 : index
    %73 = vector.load %arg8[%c0_38, %c0_39] : memref<2x128xf32, #tpu.memory_space<vmem>>, vector<1x128xf32>
    %74 = vector.broadcast %73 : vector<1x128xf32> to vector<8x128xf32>
    %75 = arith.addf %72, %74 : vector<8x128xf32>
    %cst_40 = arith.constant 0.000000e+00 : f32
    %76 = vector.broadcast %cst_40 : f32 to vector<8x128xf32>
    %77 = arith.maximumf %75, %76 : vector<8x128xf32>
    %78 = arith.truncf %77 : vector<8x128xf32> to vector<8x128xbf16>
    %c0_41 = arith.constant 0 : index
    %c0_42 = arith.constant 0 : index
    %79 = vector.load %arg9[%c0_41, %c0_42] : memref<128x128xbf16, #tpu.memory_space<vmem>>, vector<128x128xbf16>
    %cst_43 = arith.constant dense<0.000000e+00> : vector<8x128xf32>
    %80 = tpu.matmul %78, %79, %cst_43 {dimension_numbers = #tpu.dot_dimension_numbers<[1], [0], [0], [1], [0, 0, 1, 1], [], []>} : vector<8x128xbf16>, vector<128x128xbf16>, vector<8x128xf32> -> vector<8x128xf32>
    %c1_44 = arith.constant 1 : index
    %c0_45 = arith.constant 0 : index
    %81 = vector.load %arg8[%c1_44, %c0_45] : memref<2x128xf32, #tpu.memory_space<vmem>>, vector<1x128xf32>
    %82 = vector.broadcast %81 : vector<1x128xf32> to vector<8x128xf32>
    %83 = arith.addf %80, %82 : vector<8x128xf32>
    %cst_46 = arith.constant 0.000000e+00 : f32
    %84 = vector.broadcast %cst_46 : f32 to vector<8x128xf32>
    %85 = arith.maximumf %83, %84 : vector<8x128xf32>
    %86 = arith.truncf %85 : vector<8x128xf32> to vector<8x128xbf16>
    %c0_47 = arith.constant 0 : index
    %c0_48 = arith.constant 0 : index
    %87 = vector.load %arg10[%c0_47, %c0_48] : memref<128x128xbf16, #tpu.memory_space<vmem>>, vector<128x128xbf16>
    %cst_49 = arith.constant dense<0.000000e+00> : vector<8x128xf32>
    %88 = tpu.matmul %86, %87, %cst_49 {dimension_numbers = #tpu.dot_dimension_numbers<[1], [0], [0], [1], [0, 0, 1, 1], [], []>} : vector<8x128xbf16>, vector<128x128xbf16>, vector<8x128xf32> -> vector<8x128xf32>
    %c0_50 = arith.constant 0 : index
    %c0_51 = arith.constant 0 : index
    %89 = vector.load %arg11[%c0_50, %c0_51] : memref<1x128xf32, #tpu.memory_space<vmem>>, vector<1x128xf32>
    %90 = vector.broadcast %89 : vector<1x128xf32> to vector<8x128xf32>
    %91 = arith.addf %88, %90 : vector<8x128xf32>
    %92 = math.tanh %91 : vector<8x128xf32>
    %c0_52 = arith.constant 0 : index
    %c0_53 = arith.constant 0 : index
    %93 = vector.load %arg12[%c0_52, %c0_53] : memref<8x128xf32, #tpu.memory_space<vmem>>, vector<8x128xf32>
    tpu.vector_store %arg12[%c0_52, %c0_53], %92 {strides = array<i32>} : memref<8x128xf32, #tpu.memory_space<vmem>>, vector<8x128xf32>,
    return
  }
  func.func @transform_0(%arg0: i32) -> (i32, i32) {
    %c0_i32 = arith.constant 0 : i32
    %c0_i32_0 = arith.constant 0 : i32
    return %arg0, %c0_i32 : i32, i32
  }
  func.func @transform_1(%arg0: i32) -> (i32, i32) {
    %c0_i32 = arith.constant 0 : i32
    %c0_i32_0 = arith.constant 0 : i32
    return %arg0, %c0_i32 : i32, i32
  }
  func.func @transform_2(%arg0: i32) -> (i32, i32) {
    %c0_i32 = arith.constant 0 : i32
    %c0_i32_0 = arith.constant 0 : i32
    %c0_i32_1 = arith.constant 0 : i32
    return %c0_i32, %c0_i32_0 : i32, i32
  }
  func.func @transform_3(%arg0: i32) -> (i32, i32) {
    %c0_i32 = arith.constant 0 : i32
    %c0_i32_0 = arith.constant 0 : i32
    %c0_i32_1 = arith.constant 0 : i32
    return %c0_i32, %c0_i32_0 : i32, i32
  }
  func.func @transform_4(%arg0: i32) -> (i32, i32) {
    %c0_i32 = arith.constant 0 : i32
    %c0_i32_0 = arith.constant 0 : i32
    %c0_i32_1 = arith.constant 0 : i32
    return %c0_i32, %c0_i32_0 : i32, i32
  }
  func.func @transform_5(%arg0: i32) -> (i32, i32) {
    %c0_i32 = arith.constant 0 : i32
    %c0_i32_0 = arith.constant 0 : i32
    %c0_i32_1 = arith.constant 0 : i32
    return %c0_i32, %c0_i32_0 : i32, i32
  }
  func.func @transform_6(%arg0: i32) -> (i32, i32) {
    %c0_i32 = arith.constant 0 : i32
    %c0_i32_0 = arith.constant 0 : i32
    %c0_i32_1 = arith.constant 0 : i32
    return %c0_i32, %c0_i32_0 : i32, i32
  }
  func.func @transform_7(%arg0: i32) -> (i32, i32) {
    %c0_i32 = arith.constant 0 : i32
    %c0_i32_0 = arith.constant 0 : i32
    %c0_i32_1 = arith.constant 0 : i32
    return %c0_i32, %c0_i32_0 : i32, i32
  }
  func.func @transform_8(%arg0: i32) -> (i32, i32) {
    %c0_i32 = arith.constant 0 : i32
    %c0_i32_0 = arith.constant 0 : i32
    %c0_i32_1 = arith.constant 0 : i32
    return %c0_i32, %c0_i32_0 : i32, i32
  }
  func.func @transform_9(%arg0: i32) -> (i32, i32) {
    %c0_i32 = arith.constant 0 : i32
    %c0_i32_0 = arith.constant 0 : i32
    %c0_i32_1 = arith.constant 0 : i32
    return %c0_i32, %c0_i32_0 : i32, i32
  }
  func.func @transform_10(%arg0: i32) -> (i32, i32) {
    %c0_i32 = arith.constant 0 : i32
    %c0_i32_0 = arith.constant 0 : i32
    %c0_i32_1 = arith.constant 0 : i32
    return %c0_i32, %c0_i32_0 : i32, i32
  }
  func.func @transform_11(%arg0: i32) -> (i32, i32) {
    %c0_i32 = arith.constant 0 : i32
    %c0_i32_0 = arith.constant 0 : i32
    return %arg0, %c0_i32 : i32, i32
  }
}

</mosaic_0001>

<bundles_post_ra>
// kernel: tpu_custom_call.1
= control target key start
LH: loop header
LB: loop body
LE: loop exit
PB: predicated region body
PF: predicated region fallthrough
CT: control target
= control target key end

     0   :  { %16 = vsyncpa [#allocation4], 0  ;;  %s1468_s0 = inlined_call_operand.hbm [shape: bf16[8,128], index: 0, kind: input, shape index: {}]   ;;  %s1469_s1 = inlined_call_operand.hbm [shape: bf16[8,128], index: 1, kind: input, shape index: {}]   ;;  %s1470_s2 = inlined_call_operand.hbm [shape: bf16[128,128], index: 2, kind: input, shape index: {}]   ;;  %s1471_s3 = inlined_call_operand.vmem [shape: f32[3,128], index: 3, kind: input, shape index: {}]   ;;  %s1472_s4 = inlined_call_operand.hbm [shape: bf16[128,128], index: 4, kind: input, shape index: {}]   ;;  %s1473_s5 = inlined_call_operand.vmem [shape: f32[3,128], index: 5, kind: input, shape index: {}]   ;;  %s1474_s6 = inlined_call_operand.hbm [shape: bf16[256,128], index: 6, kind: input, shape index: {}]   ;;  %s1475_s7 = inlined_call_operand.vmem [shape: f32[2,128], index: 7, kind: input, shape index: {}]   ;;  %s1476_s8 = inlined_call_operand.hbm [shape: bf16[128,128], index: 8, kind: input, shape index: {}]   ;;  %s1477_s9 = inlined_call_operand.hbm [shape: bf16[128,128], index: 9, kind: input, shape index: {}]   ;;  %s1478_s10 = inlined_call_operand.vmem [shape: f32[1,128], index: 10, kind: input, shape index: {}]   ;;  %s1479_s11 = inlined_call_operand.hbm [shape: f32[8,128], index: 11, kind: output, shape index: {}]  }
   0x1   :  { %17 = vsyncpa [#allocation7], 0 }
   0x2   :  { %18 = vsyncpa [#allocation10], 0 }
   0x3   :  { %19 = vsyncpa [#allocation13], 0 }
   0x4   :  { %20 = vsyncpa [#allocation5], 0  ;;  %s1278_s17 = smov [#allocation6]  }
   0x5   :  { %s37_s18 = sshll.u32 %s1278_s17, 4  ;;  %s38_s18 = int_to_ptr.vmem [resolvable:$true] %s37_s18 }
   0x6   :  { %s1116_s19 = scalar_lea.vmem %s38_s18, 64  ;;  %p1121_p1 = scmp.lt.s32.totalorder %s38_s18, %s38_s18 }
   0x7   :  { %p1117_p0 = scmp.ne.s32.totalorder %s38_s18, %s1116_s19  ;;  %p1122_p2 = scmp.lt.s32.totalorder %s1116_s19, %s1116_s19 }
   0x9   :  { %p1123_p3 = por %p1122_p2, %p1121_p1 }
   0xb   :  { %p1124_p4 = pnand %p1123_p3, %p1117_p0 }
   0xd   :  { %1127 = shalt.err (!%p1124_p4)
}
   0xe   :  { %40 = dma.hbm_to_vmem [thread:$0]  %s1469_s1, 64, %s38_s18, [#allocation7]  }
   0xf   :  { %s1279_s22 = smov [#allocation9]   ;;  %s1280_s24 = smov [#allocation12]  }
  0x10   :  { %s60_s23 = sshll.u32 %s1279_s22, 4  ;;  %s88_s25 = sshll.u32 %s1280_s24, 4  ;;  %s61_s23 = int_to_ptr.vmem [resolvable:$true] %s60_s23  ;;  %s89_s25 = int_to_ptr.vmem [resolvable:$true] %s88_s25 }
  0x11   :  { %s1136_s26 = scalar_lea.vmem %s61_s23, 1024  ;;  %p1141_p6 = scmp.lt.s32.totalorder %s61_s23, %s61_s23 }
  0x12   :  { %p1137_p5 = scmp.ne.s32.totalorder %s61_s23, %s1136_s26  ;;  %p1142_p7 = scmp.lt.s32.totalorder %s1136_s26, %s1136_s26 }
  0x14   :  { %p1143_p8 = por %p1142_p7, %p1141_p6 }
  0x16   :  { %p1144_p9 = pnand %p1143_p8, %p1137_p5 }
  0x18   :  { %1147 = shalt.err (!%p1144_p9)
}
  0x19   :  { %s1281_s27 = smov 64   ;;  %s1282_s28 = smov 4  }
  0x1a   :  { %66 = dma.hbm_to_vmem [thread:$0]  %s1472_s4, 1024, %s61_s23, [#allocation10], %s1281_s27, %s1281_s27, %s1282_s28  }
  0x1b   :  { %s1156_s1 = scalar_lea.vmem %s89_s25, 1024  ;;  %p1161_p11 = scmp.lt.s32.totalorder %s89_s25, %s89_s25 }
  0x1c   :  { %p1157_p10 = scmp.ne.s32.totalorder %s89_s25, %s1156_s1  ;;  %p1162_p12 = scmp.lt.s32.totalorder %s1156_s1, %s1156_s1 }
  0x1e   :  { %p1163_p13 = por %p1162_p12, %p1161_p11 }
  0x20   :  { %p1164_p0 = pnand %p1163_p13, %p1157_p10 }
  0x22   :  { %1167 = shalt.err (!%p1164_p0)
}
  0x23   :  { %94 = dma.hbm_to_vmem [thread:$0]  %s1476_s8, 1024, %s89_s25, [#allocation13], %s1281_s27, %s1281_s27, %s1282_s28  }
  0x24   :  { %s1283_s14 = smov [#allocation3]   ;;  %s1284_s16 = smov [#allocation8]  }
  0x25   :  { %s27_s15 = sshll.u32 %s1283_s14, 4  ;;  %s46_s4 = sshll.u32 %s1284_s16, 4  ;;  %s28_s15 = int_to_ptr.vmem [resolvable:$true] %s27_s15  ;;  %s47_s4 = int_to_ptr.vmem [resolvable:$true] %s46_s4 }
  0x26   :  { %s1176_s17 = scalar_lea.vmem %s28_s15, 64  ;;  %p1181_p2 = scmp.lt.s32.totalorder %s28_s15, %s28_s15 }
  0x27   :  { %p1177_p1 = scmp.ne.s32.totalorder %s28_s15, %s1176_s17  ;;  %p1182_p3 = scmp.lt.s32.totalorder %s1176_s17, %s1176_s17 }
  0x29   :  { %p1183_p4 = por %p1182_p3, %p1181_p2 }
  0x2b   :  { %p1184_p5 = pnand %p1183_p4, %p1177_p1 }
  0x2d   :  { %1187 = shalt.err (!%p1184_p5)
}
  0x2e   :  { %30 = dma.hbm_to_vmem [thread:$0]  %s1468_s0, 64, %s28_s15, [#allocation4]  }
  0x2f   :  { %s1196_s20 = scalar_lea.vmem %s47_s4, 1024  ;;  %p1201_p7 = scmp.lt.s32.totalorder %s47_s4, %s47_s4 }
  0x30   :  { %p1197_p6 = scmp.ne.s32.totalorder %s47_s4, %s1196_s20  ;;  %p1202_p8 = scmp.lt.s32.totalorder %s1196_s20, %s1196_s20 }
  0x32   :  { %p1203_p9 = por %p1202_p8, %p1201_p7 }
  0x34   :  { %p1204_p10 = pnand %p1203_p9, %p1197_p6 }
  0x36   :  { %1207 = shalt.err (!%p1204_p10)
}
  0x37   :  { %52 = dma.hbm_to_vmem [thread:$0]  %s1470_s2, 1024, %s47_s4, [#allocation7], %s1281_s27, %s1281_s27, %s1282_s28  }
  0x38   :  { %s1285_s22 = smov [#allocation11]   ;;  %s1286_s24 = smov [#allocation14]  }
  0x39   :  { %s74_s23 = sshll.u32 %s1285_s22, 4  ;;  %s100_s0 = sshll.u32 %s1286_s24, 4  ;;  %s75_s23 = int_to_ptr.vmem [resolvable:$true] %s74_s23  ;;  %s101_s0 = int_to_ptr.vmem [resolvable:$true] %s100_s0 }
  0x3a   :  { %s1216_s25 = scalar_lea.vmem %s75_s23, 2048  ;;  %p1221_p12 = scmp.lt.s32.totalorder %s75_s23, %s75_s23 }
  0x3b   :  { %p1217_p11 = scmp.ne.s32.totalorder %s75_s23, %s1216_s25  ;;  %p1222_p13 = scmp.lt.s32.totalorder %s1216_s25, %s1216_s25 }
  0x3d   :  { %p1223_p0 = por %p1222_p13, %p1221_p12 }
  0x3f   :  { %p1224_p1 = pnand %p1223_p0, %p1217_p11 }
  0x41   :  { %1227 = shalt.err (!%p1224_p1)
}
  0x42   :  { %80 = dma.hbm_to_vmem [thread:$0]  %s1474_s6, 2048, %s75_s23, [#allocation10], %s1281_s27, %s1281_s27, %s1282_s28  }
  0x43   :  { %s1236_s2 = scalar_lea.vmem %s101_s0, 1024  ;;  %p1241_p3 = scmp.lt.s32.totalorder %s101_s0, %s101_s0 }
  0x44   :  { %p1237_p2 = scmp.ne.s32.totalorder %s101_s0, %s1236_s2  ;;  %p1242_p4 = scmp.lt.s32.totalorder %s1236_s2, %s1236_s2 }
  0x46   :  { %p1243_p5 = por %p1242_p4, %p1241_p3 }
  0x48   :  { %p1244_p6 = pnand %p1243_p5, %p1237_p2 }
  0x4a   :  { %1247 = shalt.err (!%p1244_p6)
}
  0x4b   :  { %106 = dma.hbm_to_vmem [thread:$0]  %s1477_s9, 1024, %s101_s0, [#allocation13], %s1281_s27, %s1281_s27, %s1282_s28  }
  0x4c   :  { %1268 = dma.done.wait [#allocation4], 64  }
  0x4d   :  { %1269 = vsyncadd [#allocation4], 4294967232 }
  0x4e   :  { %1270 = dma.done.wait [#allocation7], 1088  }
  0x4f   :  { %1271 = vsyncadd [#allocation7], 4294966208 }
  0x50   :  { %1272 = dma.done.wait [#allocation10], 3072  }
  0x51   :  { %1273 = vsyncadd [#allocation10], 4294964224 }
  0x52   :  { %1274 = dma.done.wait [#allocation13], 2048  }
  0x53   :  { %1275 = vsyncadd [#allocation13], 4294965248  ;;  %v1287_v0 = vmov 0.0   ;;  %vm1288_vm0 = vmmov 0   ;;  %v1050_v1 = vld [vmem:[#allocation8 + $0x38] sm:$0xff]   ;;  %v1052_v3 = vld [vmem:[#allocation8 + $0x30] sm:$0xff]  }
  0x54   :  { %958 = vmatprep.subr.bf16.mxu0 %v1287_v0  ;;  %978 = vmatprep.subr.bf16.mxu1 %v1287_v0  ;;  %v1051_v2 = vld [vmem:[#allocation9 + $0x38] sm:$0xff]   ;;  %v1053_v4 = vld [vmem:[#allocation9 + $0x30] sm:$0xff]   ;;  %v1054_v5 = vld [vmem:[#allocation8 + $0x28] sm:$0xff]   ;;  %s1289_s22 = smov [#allocation15]  }
  0x55   :  { %974 = vmatprep.mubr.msk.bf16.mxu0 %vm1288_vm0, %v1287_v0  ;;  %994 = vmatprep.mubr.msk.bf16.mxu1 %vm1288_vm0, %v1287_v0  ;;  %v1055_v6 = vld [vmem:[#allocation9 + $0x28] sm:$0xff]   ;;  %v1056_v7 = vld [vmem:[#allocation8 + $0x20] sm:$0xff]   ;;  %v1058_v9 = vld [vmem:[#allocation8 + $0x18] sm:$0xff]  }
  0x56   :  { %959 = vmatpush3.bf16.msra.mxu0 %v1050_v1  ;;  %979 = vmatpush3.bf16.msra.mxu1 %v1051_v2  ;;  %v1057_v8 = vld [vmem:[#allocation9 + $0x20] sm:$0xff]   ;;  %v1059_v10 = vld [vmem:[#allocation9 + $0x18] sm:$0xff]   ;;  %v1060_v11 = vld [vmem:[#allocation8 + $0x10] sm:$0xff]  }
  0x57   :  { %960 = vmatprep.subr.bf16.mxu0 %v1287_v0  ;;  %980 = vmatprep.subr.bf16.mxu1 %v1287_v0  ;;  %v1061_v12 = vld [vmem:[#allocation9 + $0x10] sm:$0xff]   ;;  %v1062_v13 = vld [vmem:[#allocation8 + $0x8] sm:$0xff]   ;;  %v1064_v15 = vld [vmem:[#allocation8] sm:$0xff]  }
  0x58   :  { %v1063_v14 = vld [vmem:[#allocation9 + $0x8] sm:$0xff]   ;;  %v1065_v16 = vld [vmem:[#allocation9] sm:$0xff]   ;;  %v131_v17 = vld [vmem:[#allocation3] sm:$0xf] }
  0x59   :  { %v268_v18 = vld [vmem:[#allocation6] sm:$0xf]  ;;  %v834_v19 = vld [vmem:[%s1471_s3] ss:$0 sm:$0xff]  ;;  %v1068_v35 = vld [vmem:[#allocation11 + $0x70] sm:$0xff]  }
  0x5a   :  { %961 = vmatpush3.bf16.msra.mxu0 %v1052_v3  ;;  %981 = vmatpush3.bf16.msra.mxu1 %v1053_v4  ;;  %v845_v20 = vld [vmem:[%s1473_s5] ss:$0 sm:$0xff]  ;;  %v1069_v36 = vld [vmem:[#allocation11 + $0x30] sm:$0xff]   ;;  %v1070_v37 = vld [vmem:[#allocation11 + $0x68] sm:$0xff]  }
  0x5b   :  { %962 = vmatprep.subr.bf16.mxu0 %v1287_v0  ;;  %982 = vmatprep.subr.bf16.mxu1 %v1287_v0  ;;  %v1066_v33 = vld [vmem:[#allocation11 + $0x78] sm:$0xff]   ;;  %v1071_v38 = vld [vmem:[#allocation11 + $0x28] sm:$0xff]   ;;  %v1072_v39 = vld [vmem:[#allocation11 + $0x60] sm:$0xff]  }
  0x5c   :  { %v1067_v34 = vld [vmem:[#allocation11 + $0x38] sm:$0xff]   ;;  %v1073_v40 = vld [vmem:[#allocation11 + $0x20] sm:$0xff]   ;;  %v1076_v43 = vld [vmem:[#allocation11 + $0x50] sm:$0xff]  }
  0x5d   :  { %v1074_v41 = vld [vmem:[#allocation11 + $0x58] sm:$0xff]   ;;  %v1077_v44 = vld [vmem:[#allocation11 + $0x10] sm:$0xff]   ;;  %v1078_v45 = vld [vmem:[#allocation11 + $0x48] sm:$0xff]  }
  0x5e   :  { %963 = vmatpush3.bf16.msra.mxu0 %v1054_v5  ;;  %983 = vmatpush3.bf16.msra.mxu1 %v1055_v6  ;;  %v1075_v42 = vld [vmem:[#allocation11 + $0x18] sm:$0xff]   ;;  %v1079_v46 = vld [vmem:[#allocation11 + $0x8] sm:$0xff]   ;;  %v1080_v47 = vld [vmem:[#allocation11 + $0x40] sm:$0xff]  }
  0x5f   :  { %964 = vmatprep.subr.bf16.mxu0 %v1287_v0  ;;  %984 = vmatprep.subr.bf16.mxu1 %v1287_v0  ;;  %v1081_v48 = vld [vmem:[#allocation11] sm:$0xff]   ;;  %v1082_v49 = vld [vmem:[#allocation12 + $0x38] sm:$0xff]   ;;  %v1083_v50 = vld [vmem:[#allocation12 + $0x30] sm:$0xff]  }
  0x60   :  { %v1084_v51 = vld [vmem:[#allocation12 + $0x28] sm:$0xff]   ;;  %v1085_v52 = vld [vmem:[#allocation12 + $0x20] sm:$0xff]   ;;  %v1086_v53 = vld [vmem:[#allocation12 + $0x18] sm:$0xff]  }
  0x62   :  { %965 = vmatpush3.bf16.msra.mxu0 %v1056_v7  ;;  %985 = vmatpush3.bf16.msra.mxu1 %v1057_v8 }
  0x63   :  { %966 = vmatprep.subr.bf16.mxu0 %v1287_v0  ;;  %986 = vmatprep.subr.bf16.mxu1 %v1287_v0 }
  0x66   :  { %967 = vmatpush3.bf16.msra.mxu0 %v1058_v9  ;;  %987 = vmatpush3.bf16.msra.mxu1 %v1059_v10  ;;  %v854_v9 = vld [vmem:[%s1473_s5 + $0x1] ss:$0 sm:$0xff] }
  0x67   :  { %968 = vmatprep.subr.bf16.mxu0 %v1287_v0  ;;  %988 = vmatprep.subr.bf16.mxu1 %v1287_v0 }
  0x6a   :  { %969 = vmatpush3.bf16.msra.mxu0 %v1060_v11  ;;  %989 = vmatpush3.bf16.msra.mxu1 %v1061_v12  ;;  %v855_v11 = vld [vmem:[%s1473_s5 + $0x2] ss:$0 sm:$0xff] }
  0x6b   :  { %970 = vmatprep.subr.bf16.mxu0 %v1287_v0  ;;  %990 = vmatprep.subr.bf16.mxu1 %v1287_v0 }
  0x6e   :  { %971 = vmatpush3.bf16.msra.mxu0 %v1062_v13  ;;  %991 = vmatpush3.bf16.msra.mxu1 %v1063_v14 }
  0x6f   :  { %972 = vmatprep.subr.bf16.mxu0 %v1287_v0  ;;  %992 = vmatprep.subr.bf16.mxu1 %v1287_v0 }
  0x72   :  { %973 = vmatpush3.bf16.msra.mxu0 %v1064_v15  ;;  %993 = vmatpush3.bf16.msra.mxu1 %v1065_v16  ;;  %v843_v15 = vld [vmem:[%s1471_s3 + $0x1] ss:$0 sm:$0xff] }
  0x73   :  { %998 = vmatprep.subr.bf16.mxu1 %v1287_v0  ;;  %918 = vmatprep.subr.bf16.mxu0 %v1066_v33  ;;  %v1095_v33 = vld [vmem:[#allocation14 + $0x10] sm:$0xff]  }
  0x75   :  { %975 = vmatmul.mubr.bf16.vlgmr.msra.gmra.mxu0 %v131_v17  ;;  %995 = vmatmul.mubr.bf16.vlgmr.msra.gmra.mxu1 %v268_v18  ;;  %v844_v18 = vld [vmem:[%s1471_s3 + $0x2] ss:$0 sm:$0xff] }
  0x76   :  { %1014 = vmatprep.mubr.msk.bf16.mxu1 %vm1288_vm0, %v1287_v0  ;;  %919 = vmatpush3.bf16.msra.mxu0 %v1067_v34 }
  0x77   :  { %920 = vmatprep.subr.bf16.mxu0 %v1068_v35  ;;  %999 = vmatpush3.bf16.msra.mxu1 %v1082_v49  ;;  %v856_v35 = vld [vmem:[%s1475_s7] ss:$0 sm:$0xff] }
  0x78   :  { %1000 = vmatprep.subr.bf16.mxu1 %v1287_v0 }
  0x7a   :  { %921 = vmatpush3.bf16.msra.mxu0 %v1069_v36 }
  0x7b   :  { %922 = vmatprep.subr.bf16.mxu0 %v1070_v37  ;;  %1001 = vmatpush3.bf16.msra.mxu1 %v1083_v50 }
  0x7c   :  { %1002 = vmatprep.subr.bf16.mxu1 %v1287_v0 }
  0x7e   :  { %923 = vmatpush3.bf16.msra.mxu0 %v1071_v38 }
  0x7f   :  { %924 = vmatprep.subr.bf16.mxu0 %v1072_v39  ;;  %1003 = vmatpush3.bf16.msra.mxu1 %v1084_v51 }
  0x80   :  { %1004 = vmatprep.subr.bf16.mxu1 %v1287_v0 }
  0x82   :  { %925 = vmatpush3.bf16.msra.mxu0 %v1073_v40 }
  0x83   :  { %926 = vmatprep.subr.bf16.mxu0 %v1074_v41  ;;  %1005 = vmatpush3.bf16.msra.mxu1 %v1085_v52 }
  0x84   :  { %1006 = vmatprep.subr.bf16.mxu1 %v1287_v0 }
  0x86   :  { %927 = vmatpush3.bf16.msra.mxu0 %v1075_v42 }
  0x87   :  { %928 = vmatprep.subr.bf16.mxu0 %v1076_v43  ;;  %1007 = vmatpush3.bf16.msra.mxu1 %v1086_v53  ;;  %v1096_v43 = vld [vmem:[#allocation14 + $0x8] sm:$0xff]   ;;  %v884_v53 = vld [vmem:[%s1478_s10] ss:$0 sm:$0xff] }
  0x88   :  { %1008 = vmatprep.subr.bf16.mxu1 %v1287_v0 }
  0x8a   :  { %929 = vmatpush3.bf16.msra.mxu0 %v1077_v44  ;;  %v1097_v44 = vld [vmem:[#allocation14] sm:$0xff]  }
  0x8b   :  { %930 = vmatprep.subr.bf16.mxu0 %v1078_v45  ;;  %v875_v45 = vld [vmem:[%s1475_s7 + $0x1] ss:$0 sm:$0xff]  ;;  %s822_s7 = sshll.u32 %s1289_s22, 4  ;;  %s823_s7 = int_to_ptr.vmem [resolvable:$true] %s822_s7 }
  0x8c   :  { %s1248_s23 = scalar_lea.vmem %s823_s7, 128  ;;  %p1253_p8 = scmp.lt.s32.totalorder %s823_s7, %s823_s7 }
  0x8d   :  { %p1249_p7 = scmp.ne.s32.totalorder %s823_s7, %s1248_s23  ;;  %p1254_p9 = scmp.lt.s32.totalorder %s1248_s23, %s1248_s23 }
  0x8e   :  { %931 = vmatpush3.bf16.msra.mxu0 %v1079_v46 }
  0x8f   :  { %932 = vmatprep.subr.bf16.mxu0 %v1080_v47  ;;  %p1255_p10 = por %p1254_p9, %p1253_p8 }
  0x91   :  { %p1256_p11 = pnand %p1255_p10, %p1249_p7 }
  0x92   :  { %933 = vmatpush3.bf16.msra.mxu0 %v1081_v48 }
  0x93   :  { %1018 = vmatprep.subr.bf16.mxu0 %v1287_v0 }
 0x135   :  { %v235_v21 = vpop.f32.mrf.mxu0  ;;  %v372_v22 = vpop.f32.mrf.mxu1 }
 0x136   :  { %v1415_v23 = vadd.f32 %v834_v19, %v235_v21  ;;  %v1417_v24 = vadd.f32 %v845_v20, %v372_v22 }
 0x137   :  { %v976_v25 = vpop.f32.mrf.mxu0  ;;  %v996_v26 = vpop.f32.mrf.mxu1 }
 0x138   :  { %378 = vadd.xlane.f32.xlu0 %v1417_v24  ;;  %v380_v28 = vmul.f32 %v1417_v24, %v1417_v24  ;;  %v243_v31 = vmul.f32 %v1415_v23, %v1415_v23  ;;  %v1087_v25 = vld [vmem:[#allocation12 + $0x10] sm:$0xff]   ;;  %v1088_v26 = vld [vmem:[#allocation12 + $0x8] sm:$0xff]  }
 0x139   :  { %v238_v27 = vpop.f32.mrf.mxu0  ;;  %v375_v29 = vpop.f32.mrf.mxu1  ;;  %1009 = vmatpush3.bf16.msra.mxu1 %v1087_v25 }
 0x13a   :  { %381 = vadd.xlane.f32.xlu1 %v380_v28  ;;  %1010 = vmatprep.subr.bf16.mxu1 %v1287_v0  ;;  %v1089_v27 = vld [vmem:[#allocation12] sm:$0xff]   ;;  %v1090_v28 = vld [vmem:[#allocation14 + $0x38] sm:$0xff]   ;;  %v1091_v29 = vld [vmem:[#allocation14 + $0x30] sm:$0xff]  }
 0x13b   :  { %v977_v30 = vpop.f32.mrf.mxu0  ;;  %v997_v32 = vpop.f32.mrf.mxu1 }
 0x13c   :  { %241 = vadd.xlane.f32.xlu0 %v1415_v23  ;;  %v1092_v30 = vld [vmem:[#allocation14 + $0x28] sm:$0xff]   ;;  %v1094_v32 = vld [vmem:[#allocation14 + $0x18] sm:$0xff]  }
 0x13d   :  { %1011 = vmatpush3.bf16.msra.mxu1 %v1088_v26 }
 0x13e   :  { %244 = vadd.xlane.f32.xlu1 %v243_v31  ;;  %1012 = vmatprep.subr.bf16.mxu1 %v1287_v0  ;;  %v1093_v31 = vld [vmem:[#allocation14 + $0x20] sm:$0xff]  }
 0x141   :  { %1013 = vmatpush3.bf16.msra.mxu1 %v1089_v27 }
 0x1c1   :  { %v379_v54 = vpop.xlane.xlu0 %378 }
 0x1c2   :  { %v383_v55 = vmul.f32 0.03125, %v379_v54 }
 0x1c3   :  { %v382_v56 = vpop.xlane.xlu1 %381 }
 0x1c4   :  { %v385_v57 = vmul.f32 %v383_v55, %v383_v55  ;;  %v384_v58 = vmul.f32 0.03125, %v382_v56  ;;  %v388_v7 = vsub.f32 %v1417_v24, %v383_v55 }
 0x1c5   :  { %v242_v59 = vpop.xlane.xlu0 %241 }
 0x1c6   :  { %v386_v60 = vsub.f32 %v384_v58, %v385_v57  ;;  %v246_v61 = vmul.f32 0.03125, %v242_v59 }
 0x1c7   :  { %v245_v62 = vpop.xlane.xlu1 %244 }
 0x1c8   :  { %v387_v63 = vmax.f32 %v386_v60, 0.0  ;;  %v248_v1 = vmul.f32 %v246_v61, %v246_v61  ;;  %v247_v2 = vmul.f32 0.03125, %v245_v62  ;;  %v251_v12 = vsub.f32 %v1415_v23, %v246_v61 }
 0x1ca   :  { %v389_v3 = vadd.f32 1e-05, %v387_v63  ;;  %v249_v4 = vsub.f32 %v247_v2, %v248_v1 }
 0x1cc   :  { %1098 = vrsqrt.f32 %v389_v3  ;;  %v250_v5 = vmax.f32 %v249_v4, 0.0 }
 0x1ce   :  { %v252_v6 = vadd.f32 1e-05, %v250_v5 }
 0x1d0   :  { %1100 = vrsqrt.f32 %v252_v6 }
 0x1d9   :  { %v1099_v8 = vpop.eup %1098 }
 0x1da   :  { %v391_v10 = vmul.f32 %v1099_v8, %v388_v7 }
 0x1dc   :  { %v397_v13 = vmul.f32 %v854_v9, %v391_v10 }
 0x1dd   :  { %v1101_v14 = vpop.eup %1100 }
 0x1de   :  { %v403_v16 = vadd.f32 %v855_v11, %v397_v13  ;;  %v254_v17 = vmul.f32 %v1101_v14, %v251_v12 }
 0x1e0   :  { %1102 = vtanh.f32 %v403_v16  ;;  %v260_v19 = vmul.f32 %v843_v15, %v254_v17 }
 0x1e2   :  { %v266_v20 = vadd.f32 %v844_v18, %v260_v19 }
 0x1e4   :  { %1104 = vtanh.f32 %v266_v20 }
 0x1ed   :  { %v1103_v21 = vpop.eup %1102 }
 0x1ee   :  { %v899_v22 = vpack.c.bf16 %v1103_v21, %v1103_v21 }
 0x1f0   :  { %582 = vmatprep.mubr.bf16.mxu0 %v899_v22 }
 0x1f1   :  { %v1105_v23 = vpop.eup %1104 }
 0x1f2   :  { %v898_v24 = vpack.c.bf16 %v1105_v23, %v1105_v23 }
 0x1f4   :  { %583 = vmatmul.mubr.bf16.vlgmr.msra.gmra.mxu0 %v898_v24 }
 0x1f5   :  { %1034 = vmatprep.mubr.msk.bf16.mxu0 %vm1288_vm0, %v1287_v0  ;;  %1019 = vmatpush3.bf16.msra.mxu0 %v1090_v28 }
 0x1f6   :  { %1020 = vmatprep.subr.bf16.mxu0 %v1287_v0 }
 0x1f9   :  { %1021 = vmatpush3.bf16.msra.mxu0 %v1091_v29 }
 0x1fa   :  { %1022 = vmatprep.subr.bf16.mxu0 %v1287_v0 }
 0x1fd   :  { %1023 = vmatpush3.bf16.msra.mxu0 %v1092_v30 }
 0x1fe   :  { %1024 = vmatprep.subr.bf16.mxu0 %v1287_v0 }
 0x201   :  { %1025 = vmatpush3.bf16.msra.mxu0 %v1093_v31 }
 0x202   :  { %1026 = vmatprep.subr.bf16.mxu0 %v1287_v0 }
 0x205   :  { %1027 = vmatpush3.bf16.msra.mxu0 %v1094_v32 }
 0x206   :  { %1028 = vmatprep.subr.bf16.mxu0 %v1287_v0 }
 0x209   :  { %1029 = vmatpush3.bf16.msra.mxu0 %v1095_v33 }
 0x20a   :  { %1030 = vmatprep.subr.bf16.mxu0 %v1287_v0 }
 0x20d   :  { %1031 = vmatpush3.bf16.msra.mxu0 %v1096_v43 }
 0x20e   :  { %1032 = vmatprep.subr.bf16.mxu0 %v1287_v0 }
 0x211   :  { %1033 = vmatpush3.bf16.msra.mxu0 %v1097_v44 }
 0x2b4   :  { %v934_v34 = vpop.f32.mrf.mxu0 }
 0x2b6   :  { %v935_v36 = vpop.f32.mrf.mxu0 }
 0x2b7   :  { %v936_v37 = vadd.f32 %v935_v36, %v934_v34 }
 0x2b8   :  { %v937_v38 = vpop.f32.mrf.mxu0 }
 0x2b9   :  { %v585_v39 = vadd.f32 %v936_v37, %v856_v35 }
 0x2ba   :  { %v938_v40 = vpop.f32.mrf.mxu0 }
 0x2bb   :  { %v590_v41 = vmax.f32 %v585_v39, 0.0 }
 0x2bd   :  { %v591_v42 = vpack.c.bf16 %v590_v41, %v590_v41 }
 0x2bf   :  { %1015 = vmatmul.mubr.bf16.vlgmr.msra.gmra.mxu1 %v591_v42 }
 0x37f   :  { %v695_v46 = vpop.f32.mrf.mxu1 }
 0x380   :  { %v696_v47 = vadd.f32 %v875_v45, %v695_v46 }
 0x381   :  { %v1016_v48 = vpop.f32.mrf.mxu1 }
 0x382   :  { %v701_v49 = vmax.f32 %v696_v47, 0.0 }
 0x383   :  { %v698_v50 = vpop.f32.mrf.mxu1 }
 0x384   :  { %v702_v51 = vpack.c.bf16 %v701_v49, %v701_v49 }
 0x385   :  { %v1017_v52 = vpop.f32.mrf.mxu1 }
 0x386   :  { %1035 = vmatmul.mubr.bf16.vlgmr.msra.gmra.mxu0 %v702_v51 }
 0x446   :  { %v808_v54 = vpop.f32.mrf.mxu0 }
 0x447   :  { %v809_v0 = vadd.f32 %v884_v53, %v808_v54 }
 0x448   :  { %v1036_v55 = vpop.f32.mrf.mxu0 }
 0x449   :  { %1106 = vtanh.f32 %v809_v0 }
 0x44a   :  { %v811_v56 = vpop.f32.mrf.mxu0 }
 0x44c   :  { %v1037_v57 = vpop.f32.mrf.mxu0 }
 0x456   :  { %v1107_v58 = vpop.eup %1106 }
 0x457   :  { %815 = vst [vmem:[#allocation15] sm:$0xff] %v1107_v58 }
 0x458   :  { %1259 = shalt.err (!%p1256_p11)
}
 0x459   :  { %825 = dma.vmem_to_hbm [thread:$0]  %s823_s7, 128, %s1479_s11, [#allocation5]  }
 0x45a   :  { %1276 = dma.done.wait [#allocation5], 128  }
 0x45b   :  { %1277 = vsyncadd [#allocation5], 4294967168 }
 0x45c   :  { %829 = vsyncpa [#allocation4], 1 }
 0x45d   :  { %830 = vsyncpa [#allocation7], 1 }
 0x45e   :  { %831 = vsyncpa [#allocation10], 1 }
 0x45f   :  { %832 = vsyncpa [#allocation13], 1 }
 0x460   :  { %833 = vsyncpa [#allocation5], 1 }

// kernel: tpu_custom_call.1
= control target key start
LH: loop header
LB: loop body
LE: loop exit
PB: predicated region body
PF: predicated region fallthrough
CT: control target
= control target key end

     0   :  { %16 = vsyncpa [#allocation4], 0  ;;  %s1468_s0 = inlined_call_operand.hbm [shape: bf16[8,128], index: 0, kind: input, shape index: {}]   ;;  %s1469_s1 = inlined_call_operand.hbm [shape: bf16[8,128], index: 1, kind: input, shape index: {}]   ;;  %s1470_s2 = inlined_call_operand.hbm [shape: bf16[128,128], index: 2, kind: input, shape index: {}]   ;;  %s1471_s3 = inlined_call_operand.vmem [shape: f32[3,128], index: 3, kind: input, shape index: {}]   ;;  %s1472_s4 = inlined_call_operand.hbm [shape: bf16[128,128], index: 4, kind: input, shape index: {}]   ;;  %s1473_s5 = inlined_call_operand.vmem [shape: f32[3,128], index: 5, kind: input, shape index: {}]   ;;  %s1474_s6 = inlined_call_operand.hbm [shape: bf16[256,128], index: 6, kind: input, shape index: {}]   ;;  %s1475_s7 = inlined_call_operand.vmem [shape: f32[2,128], index: 7, kind: input, shape index: {}]   ;;  %s1476_s8 = inlined_call_operand.hbm [shape: bf16[128,128], index: 8, kind: input, shape index: {}]   ;;  %s1477_s9 = inlined_call_operand.hbm [shape: bf16[128,128], index: 9, kind: input, shape index: {}]   ;;  %s1478_s10 = inlined_call_operand.vmem [shape: f32[1,128], index: 10, kind: input, shape index: {}]   ;;  %s1479_s11 = inlined_call_operand.hbm [shape: f32[8,128], index: 11, kind: output, shape index: {}]  }
   0x1   :  { %17 = vsyncpa [#allocation7], 0 }
   0x2   :  { %18 = vsyncpa [#allocation10], 0 }
   0x3   :  { %19 = vsyncpa [#allocation13], 0 }
   0x4   :  { %20 = vsyncpa [#allocation5], 0  ;;  %s1278_s17 = smov [#allocation6]  }
   0x5   :  { %s37_s18 = sshll.u32 %s1278_s17, 4  ;;  %s38_s18 = int_to_ptr.vmem [resolvable:$true] %s37_s18 }
   0x6   :  { %s1116_s19 = scalar_lea.vmem %s38_s18, 64  ;;  %p1121_p1 = scmp.lt.s32.totalorder %s38_s18, %s38_s18 }
   0x7   :  { %p1117_p0 = scmp.ne.s32.totalorder %s38_s18, %s1116_s19  ;;  %p1122_p2 = scmp.lt.s32.totalorder %s1116_s19, %s1116_s19 }
   0x9   :  { %p1123_p3 = por %p1122_p2, %p1121_p1 }
   0xb   :  { %p1124_p4 = pnand %p1123_p3, %p1117_p0 }
   0xd   :  { %1127 = shalt.err (!%p1124_p4)
}
   0xe   :  { %40 = dma.hbm_to_vmem [thread:$0]  %s1469_s1, 64, %s38_s18, [#allocation7]  }
   0xf   :  { %s1279_s22 = smov [#allocation9]   ;;  %s1280_s24 = smov [#allocation12]  }
  0x10   :  { %s60_s23 = sshll.u32 %s1279_s22, 4  ;;  %s88_s25 = sshll.u32 %s1280_s24, 4  ;;  %s61_s23 = int_to_ptr.vmem [resolvable:$true] %s60_s23  ;;  %s89_s25 = int_to_ptr.vmem [resolvable:$true] %s88_s25 }
  0x11   :  { %s1136_s26 = scalar_lea.vmem %s61_s23, 1024  ;;  %p1141_p6 = scmp.lt.s32.totalorder %s61_s23, %s61_s23 }
  0x12   :  { %p1137_p5 = scmp.ne.s32.totalorder %s61_s23, %s1136_s26  ;;  %p1142_p7 = scmp.lt.s32.totalorder %s1136_s26, %s1136_s26 }
  0x14   :  { %p1143_p8 = por %p1142_p7, %p1141_p6 }
  0x16   :  { %p1144_p9 = pnand %p1143_p8, %p1137_p5 }
  0x18   :  { %1147 = shalt.err (!%p1144_p9)
}
  0x19   :  { %s1281_s27 = smov 64   ;;  %s1282_s28 = smov 4  }
  0x1a   :  { %66 = dma.hbm_to_vmem [thread:$0]  %s1472_s4, 1024, %s61_s23, [#allocation10], %s1281_s27, %s1281_s27, %s1282_s28  }
  0x1b   :  { %s1156_s1 = scalar_lea.vmem %s89_s25, 1024  ;;  %p1161_p11 = scmp.lt.s32.totalorder %s89_s25, %s89_s25 }
  0x1c   :  { %p1157_p10 = scmp.ne.s32.totalorder %s89_s25, %s1156_s1  ;;  %p1162_p12 = scmp.lt.s32.totalorder %s1156_s1, %s1156_s1 }
  0x1e   :  { %p1163_p13 = por %p1162_p12, %p1161_p11 }
  0x20   :  { %p1164_p0 = pnand %p1163_p13, %p1157_p10 }
  0x22   :  { %1167 = shalt.err (!%p1164_p0)
}
  0x23   :  { %94 = dma.hbm_to_vmem [thread:$0]  %s1476_s8, 1024, %s89_s25, [#allocation13], %s1281_s27, %s1281_s27, %s1282_s28  }
  0x24   :  { %s1283_s14 = smov [#allocation3]   ;;  %s1284_s16 = smov [#allocation8]  }
  0x25   :  { %s27_s15 = sshll.u32 %s1283_s14, 4  ;;  %s46_s4 = sshll.u32 %s1284_s16, 4  ;;  %s28_s15 = int_to_ptr.vmem [resolvable:$true] %s27_s15  ;;  %s47_s4 = int_to_ptr.vmem [resolvable:$true] %s46_s4 }
  0x26   :  { %s1176_s17 = scalar_lea.vmem %s28_s15, 64  ;;  %p1181_p2 = scmp.lt.s32.totalorder %s28_s15, %s28_s15 }
  0x27   :  { %p1177_p1 = scmp.ne.s32.totalorder %s28_s15, %s1176_s17  ;;  %p1182_p3 = scmp.lt.s32.totalorder %s1176_s17, %s1176_s17 }
  0x29   :  { %p1183_p4 = por %p1182_p3, %p1181_p2 }
  0x2b   :  { %p1184_p5 = pnand %p1183_p4, %p1177_p1 }
  0x2d   :  { %1187 = shalt.err (!%p1184_p5)
}
  0x2e   :  { %30 = dma.hbm_to_vmem [thread:$0]  %s1468_s0, 64, %s28_s15, [#allocation4]  }
  0x2f   :  { %s1196_s20 = scalar_lea.vmem %s47_s4, 1024  ;;  %p1201_p7 = scmp.lt.s32.totalorder %s47_s4, %s47_s4 }
  0x30   :  { %p1197_p6 = scmp.ne.s32.totalorder %s47_s4, %s1196_s20  ;;  %p1202_p8 = scmp.lt.s32.totalorder %s1196_s20, %s1196_s20 }
  0x32   :  { %p1203_p9 = por %p1202_p8, %p1201_p7 }
  0x34   :  { %p1204_p10 = pnand %p1203_p9, %p1197_p6 }
  0x36   :  { %1207 = shalt.err (!%p1204_p10)
}
  0x37   :  { %52 = dma.hbm_to_vmem [thread:$0]  %s1470_s2, 1024, %s47_s4, [#allocation7], %s1281_s27, %s1281_s27, %s1282_s28  }
  0x38   :  { %s1285_s22 = smov [#allocation11]   ;;  %s1286_s24 = smov [#allocation14]  }
  0x39   :  { %s74_s23 = sshll.u32 %s1285_s22, 4  ;;  %s100_s0 = sshll.u32 %s1286_s24, 4  ;;  %s75_s23 = int_to_ptr.vmem [resolvable:$true] %s74_s23  ;;  %s101_s0 = int_to_ptr.vmem [resolvable:$true] %s100_s0 }
  0x3a   :  { %s1216_s25 = scalar_lea.vmem %s75_s23, 2048  ;;  %p1221_p12 = scmp.lt.s32.totalorder %s75_s23, %s75_s23 }
  0x3b   :  { %p1217_p11 = scmp.ne.s32.totalorder %s75_s23, %s1216_s25  ;;  %p1222_p13 = scmp.lt.s32.totalorder %s1216_s25, %s1216_s25 }
  0x3d   :  { %p1223_p0 = por %p1222_p13, %p1221_p12 }
  0x3f   :  { %p1224_p1 = pnand %p1223_p0, %p1217_p11 }
  0x41   :  { %1227 = shalt.err (!%p1224_p1)
}
  0x42   :  { %80 = dma.hbm_to_vmem [thread:$0]  %s1474_s6, 2048, %s75_s23, [#allocation10], %s1281_s27, %s1281_s27, %s1282_s28  }
  0x43   :  { %s1236_s2 = scalar_lea.vmem %s101_s0, 1024  ;;  %p1241_p3 = scmp.lt.s32.totalorder %s101_s0, %s101_s0 }
  0x44   :  { %p1237_p2 = scmp.ne.s32.totalorder %s101_s0, %s1236_s2  ;;  %p1242_p4 = scmp.lt.s32.totalorder %s1236_s2, %s1236_s2 }
  0x46   :  { %p1243_p5 = por %p1242_p4, %p1241_p3 }
  0x48   :  { %p1244_p6 = pnand %p1243_p5, %p1237_p2 }
  0x4a   :  { %1247 = shalt.err (!%p1244_p6)
}
  0x4b   :  { %106 = dma.hbm_to_vmem [thread:$0]  %s1477_s9, 1024, %s101_s0, [#allocation13], %s1281_s27, %s1281_s27, %s1282_s28  }
  0x4c   :  { %1268 = dma.done.wait [#allocation4], 64  }
  0x4d   :  { %1269 = vsyncadd [#allocation4], 4294967232 }
  0x4e   :  { %1270 = dma.done.wait [#allocation7], 1088  }
  0x4f   :  { %1271 = vsyncadd [#allocation7], 4294966208 }
  0x50   :  { %1272 = dma.done.wait [#allocation10], 3072  }
  0x51   :  { %1273 = vsyncadd [#allocation10], 4294964224 }
  0x52   :  { %1274 = dma.done.wait [#allocation13], 2048  }
  0x53   :  { %1275 = vsyncadd [#allocation13], 4294965248  ;;  %v1287_v0 = vmov 0.0   ;;  %vm1288_vm0 = vmmov 0   ;;  %v1050_v1 = vld [vmem:[#allocation8 + $0x38] sm:$0xff]   ;;  %v1052_v3 = vld [vmem:[#allocation8 + $0x30] sm:$0xff]  }
  0x54   :  { %958 = vmatprep.subr.bf16.mxu0 %v1287_v0  ;;  %978 = vmatprep.subr.bf16.mxu1 %v1287_v0  ;;  %v1051_v2 = vld [vmem:[#allocation9 + $0x38] sm:$0xff]   ;;  %v1053_v4 = vld [vmem:[#allocation9 + $0x30] sm:$0xff]   ;;  %v1054_v5 = vld [vmem:[#allocation8 + $0x28] sm:$0xff]   ;;  %s1289_s22 = smov [#allocation15]  }
  0x55   :  { %974 = vmatprep.mubr.msk.bf16.mxu0 %vm1288_vm0, %v1287_v0  ;;  %994 = vmatprep.mubr.msk.bf16.mxu1 %vm1288_vm0, %v1287_v0  ;;  %v1055_v6 = vld [vmem:[#allocation9 + $0x28] sm:$0xff]   ;;  %v1056_v7 = vld [vmem:[#allocation8 + $0x20] sm:$0xff]   ;;  %v1058_v9 = vld [vmem:[#allocation8 + $0x18] sm:$0xff]  }
  0x56   :  { %959 = vmatpush3.bf16.msra.mxu0 %v1050_v1  ;;  %979 = vmatpush3.bf16.msra.mxu1 %v1051_v2  ;;  %v1057_v8 = vld [vmem:[#allocation9 + $0x20] sm:$0xff]   ;;  %v1059_v10 = vld [vmem:[#allocation9 + $0x18] sm:$0xff]   ;;  %v1060_v11 = vld [vmem:[#allocation8 + $0x10] sm:$0xff]  }
  0x57   :  { %960 = vmatprep.subr.bf16.mxu0 %v1287_v0  ;;  %980 = vmatprep.subr.bf16.mxu1 %v1287_v0  ;;  %v1061_v12 = vld [vmem:[#allocation9 + $0x10] sm:$0xff]   ;;  %v1062_v13 = vld [vmem:[#allocation8 + $0x8] sm:$0xff]   ;;  %v1064_v15 = vld [vmem:[#allocation8] sm:$0xff]  }
  0x58   :  { %v1063_v14 = vld [vmem:[#allocation9 + $0x8] sm:$0xff]   ;;  %v1065_v16 = vld [vmem:[#allocation9] sm:$0xff]   ;;  %v131_v17 = vld [vmem:[#allocation3] sm:$0xf] }
  0x59   :  { %v268_v18 = vld [vmem:[#allocation6] sm:$0xf]  ;;  %v834_v19 = vld [vmem:[%s1471_s3] ss:$0 sm:$0xff]  ;;  %v1068_v35 = vld [vmem:[#allocation11 + $0x70] sm:$0xff]  }
  0x5a   :  { %961 = vmatpush3.bf16.msra.mxu0 %v1052_v3  ;;  %981 = vmatpush3.bf16.msra.mxu1 %v1053_v4  ;;  %v845_v20 = vld [vmem:[%s1473_s5] ss:$0 sm:$0xff]  ;;  %v1069_v36 = vld [vmem:[#allocation11 + $0x30] sm:$0xff]   ;;  %v1070_v37 = vld [vmem:[#allocation11 + $0x68] sm:$0xff]  }
  0x5b   :  { %962 = vmatprep.subr.bf16.mxu0 %v1287_v0  ;;  %982 = vmatprep.subr.bf16.mxu1 %v1287_v0  ;;  %v1066_v33 = vld [vmem:[#allocation11 + $0x78] sm:$0xff]   ;;  %v1071_v38 = vld [vmem:[#allocation11 + $0x28] sm:$0xff]   ;;  %v1072_v39 = vld [vmem:[#allocation11 + $0x60] sm:$0xff]  }
  0x5c   :  { %v1067_v34 = vld [vmem:[#allocation11 + $0x38] sm:$0xff]   ;;  %v1073_v40 = vld [vmem:[#allocation11 + $0x20] sm:$0xff]   ;;  %v1076_v43 = vld [vmem:[#allocation11 + $0x50] sm:$0xff]  }
  0x5d   :  { %v1074_v41 = vld [vmem:[#allocation11 + $0x58] sm:$0xff]   ;;  %v1077_v44 = vld [vmem:[#allocation11 + $0x10] sm:$0xff]   ;;  %v1078_v45 = vld [vmem:[#allocation11 + $0x48] sm:$0xff]  }
  0x5e   :  { %963 = vmatpush3.bf16.msra.mxu0 %v1054_v5  ;;  %983 = vmatpush3.bf16.msra.mxu1 %v1055_v6  ;;  %v1075_v42 = vld [vmem:[#allocation11 + $0x18] sm:$0xff]   ;;  %v1079_v46 = vld [vmem:[#allocation11 + $0x8] sm:$0xff]   ;;  %v1080_v47 = vld [vmem:[#allocation11 + $0x40] sm:$0xff]  }
  0x5f   :  { %964 = vmatprep.subr.bf16.mxu0 %v1287_v0  ;;  %984 = vmatprep.subr.bf16.mxu1 %v1287_v0  ;;  %v1081_v48 = vld [vmem:[#allocation11] sm:$0xff]   ;;  %v1082_v49 = vld [vmem:[#allocation12 + $0x38] sm:$0xff]   ;;  %v1083_v50 = vld [vmem:[#allocation12 + $0x30] sm:$0xff]  }
  0x60   :  { %v1084_v51 = vld [vmem:[#allocation12 + $0x28] sm:$0xff]   ;;  %v1085_v52 = vld [vmem:[#allocation12 + $0x20] sm:$0xff]   ;;  %v1086_v53 = vld [vmem:[#allocation12 + $0x18] sm:$0xff]  }
  0x62   :  { %965 = vmatpush3.bf16.msra.mxu0 %v1056_v7  ;;  %985 = vmatpush3.bf16.msra.mxu1 %v1057_v8 }
  0x63   :  { %966 = vmatprep.subr.bf16.mxu0 %v1287_v0  ;;  %986 = vmatprep.subr.bf16.mxu1 %v1287_v0 }
  0x66   :  { %967 = vmatpush3.bf16.msra.mxu0 %v1058_v9  ;;  %987 = vmatpush3.bf16.msra.mxu1 %v1059_v10  ;;  %v854_v9 = vld [vmem:[%s1473_s5 + $0x1] ss:$0 sm:$0xff] }
  0x67   :  { %968 = vmatprep.subr.bf16.mxu0 %v1287_v0  ;;  %988 = vmatprep.subr.bf16.mxu1 %v1287_v0 }
  0x6a   :  { %969 = vmatpush3.bf16.msra.mxu0 %v1060_v11  ;;  %989 = vmatpush3.bf16.msra.mxu1 %v1061_v12  ;;  %v855_v11 = vld [vmem:[%s1473_s5 + $0x2] ss:$0 sm:$0xff] }
  0x6b   :  { %970 = vmatprep.subr.bf16.mxu0 %v1287_v0  ;;  %990 = vmatprep.subr.bf16.mxu1 %v1287_v0 }
  0x6e   :  { %971 = vmatpush3.bf16.msra.mxu0 %v1062_v13  ;;  %991 = vmatpush3.bf16.msra.mxu1 %v1063_v14 }
  0x6f   :  { %972 = vmatprep.subr.bf16.mxu0 %v1287_v0  ;;  %992 = vmatprep.subr.bf16.mxu1 %v1287_v0 }
  0x72   :  { %973 = vmatpush3.bf16.msra.mxu0 %v1064_v15  ;;  %993 = vmatpush3.bf16.msra.mxu1 %v1065_v16  ;;  %v843_v15 = vld [vmem:[%s1471_s3 + $0x1] ss:$0 sm:$0xff] }
  0x73   :  { %998 = vmatprep.subr.bf16.mxu1 %v1287_v0  ;;  %918 = vmatprep.subr.bf16.mxu0 %v1066_v33  ;;  %v1095_v33 = vld [vmem:[#allocation14 + $0x10] sm:$0xff]  }
  0x75   :  { %975 = vmatmul.mubr.bf16.vlgmr.msra.gmra.mxu0 %v131_v17  ;;  %995 = vmatmul.mubr.bf16.vlgmr.msra.gmra.mxu1 %v268_v18  ;;  %v844_v18 = vld [vmem:[%s1471_s3 + $0x2] ss:$0 sm:$0xff] }
  0x76   :  { %1014 = vmatprep.mubr.msk.bf16.mxu1 %vm1288_vm0, %v1287_v0  ;;  %919 = vmatpush3.bf16.msra.mxu0 %v1067_v34 }
  0x77   :  { %920 = vmatprep.subr.bf16.mxu0 %v1068_v35  ;;  %999 = vmatpush3.bf16.msra.mxu1 %v1082_v49  ;;  %v856_v35 = vld [vmem:[%s1475_s7] ss:$0 sm:$0xff] }
  0x78   :  { %1000 = vmatprep.subr.bf16.mxu1 %v1287_v0 }
  0x7a   :  { %921 = vmatpush3.bf16.msra.mxu0 %v1069_v36 }
  0x7b   :  { %922 = vmatprep.subr.bf16.mxu0 %v1070_v37  ;;  %1001 = vmatpush3.bf16.msra.mxu1 %v1083_v50 }
  0x7c   :  { %1002 = vmatprep.subr.bf16.mxu1 %v1287_v0 }
  0x7e   :  { %923 = vmatpush3.bf16.msra.mxu0 %v1071_v38 }
  0x7f   :  { %924 = vmatprep.subr.bf16.mxu0 %v1072_v39  ;;  %1003 = vmatpush3.bf16.msra.mxu1 %v1084_v51 }
  0x80   :  { %1004 = vmatprep.subr.bf16.mxu1 %v1287_v0 }
  0x82   :  { %925 = vmatpush3.bf16.msra.mxu0 %v1073_v40 }
  0x83   :  { %926 = vmatprep.subr.bf16.mxu0 %v1074_v41  ;;  %1005 = vmatpush3.bf16.msra.mxu1 %v1085_v52 }
  0x84   :  { %1006 = vmatprep.subr.bf16.mxu1 %v1287_v0 }
  0x86   :  { %927 = vmatpush3.bf16.msra.mxu0 %v1075_v42 }
  0x87   :  { %928 = vmatprep.subr.bf16.mxu0 %v1076_v43  ;;  %1007 = vmatpush3.bf16.msra.mxu1 %v1086_v53  ;;  %v1096_v43 = vld [vmem:[#allocation14 + $0x8] sm:$0xff]   ;;  %v884_v53 = vld [vmem:[%s1478_s10] ss:$0 sm:$0xff] }
  0x88   :  { %1008 = vmatprep.subr.bf16.mxu1 %v1287_v0 }
  0x8a   :  { %929 = vmatpush3.bf16.msra.mxu0 %v1077_v44  ;;  %v1097_v44 = vld [vmem:[#allocation14] sm:$0xff]  }
  0x8b   :  { %930 = vmatprep.subr.bf16.mxu0 %v1078_v45  ;;  %v875_v45 = vld [vmem:[%s1475_s7 + $0x1] ss:$0 sm:$0xff]  ;;  %s822_s7 = sshll.u32 %s1289_s22, 4  ;;  %s823_s7 = int_to_ptr.vmem [resolvable:$true] %s822_s7 }
  0x8c   :  { %s1248_s23 = scalar_lea.vmem %s823_s7, 128  ;;  %p1253_p8 = scmp.lt.s32.totalorder %s823_s7, %s823_s7 }
  0x8d   :  { %p1249_p7 = scmp.ne.s32.totalorder %s823_s7, %s1248_s23  ;;  %p1254_p9 = scmp.lt.s32.totalorder %s1248_s23, %s1248_s23 }
  0x8e   :  { %931 = vmatpush3.bf16.msra.mxu0 %v1079_v46 }
  0x8f   :  { %932 = vmatprep.subr.bf16.mxu0 %v1080_v47  ;;  %p1255_p10 = por %p1254_p9, %p1253_p8 }
  0x91   :  { %p1256_p11 = pnand %p1255_p10, %p1249_p7 }
  0x92   :  { %933 = vmatpush3.bf16.msra.mxu0 %v1081_v48 }
  0x93   :  { %1018 = vmatprep.subr.bf16.mxu0 %v1287_v0 }
 0x135   :  { %v235_v21 = vpop.f32.mrf.mxu0  ;;  %v372_v22 = vpop.f32.mrf.mxu1 }
 0x136   :  { %v1415_v23 = vadd.f32 %v834_v19, %v235_v21  ;;  %v1417_v24 = vadd.f32 %v845_v20, %v372_v22 }
 0x137   :  { %v976_v25 = vpop.f32.mrf.mxu0  ;;  %v996_v26 = vpop.f32.mrf.mxu1 }
 0x138   :  { %378 = vadd.xlane.f32.xlu0 %v1417_v24  ;;  %v380_v28 = vmul.f32 %v1417_v24, %v1417_v24  ;;  %v243_v31 = vmul.f32 %v1415_v23, %v1415_v23  ;;  %v1087_v25 = vld [vmem:[#allocation12 + $0x10] sm:$0xff]   ;;  %v1088_v26 = vld [vmem:[#allocation12 + $0x8] sm:$0xff]  }
 0x139   :  { %v238_v27 = vpop.f32.mrf.mxu0  ;;  %v375_v29 = vpop.f32.mrf.mxu1  ;;  %1009 = vmatpush3.bf16.msra.mxu1 %v1087_v25 }
 0x13a   :  { %381 = vadd.xlane.f32.xlu1 %v380_v28  ;;  %1010 = vmatprep.subr.bf16.mxu1 %v1287_v0  ;;  %v1089_v27 = vld [vmem:[#allocation12] sm:$0xff]   ;;  %v1090_v28 = vld [vmem:[#allocation14 + $0x38] sm:$0xff]   ;;  %v1091_v29 = vld [vmem:[#allocation14 + $0x30] sm:$0xff]  }
 0x13b   :  { %v977_v30 = vpop.f32.mrf.mxu0  ;;  %v997_v32 = vpop.f32.mrf.mxu1 }
 0x13c   :  { %241 = vadd.xlane.f32.xlu0 %v1415_v23  ;;  %v1092_v30 = vld [vmem:[#allocation14 + $0x28] sm:$0xff]   ;;  %v1094_v32 = vld [vmem:[#allocation14 + $0x18] sm:$0xff]  }
 0x13d   :  { %1011 = vmatpush3.bf16.msra.mxu1 %v1088_v26 }
 0x13e   :  { %244 = vadd.xlane.f32.xlu1 %v243_v31  ;;  %1012 = vmatprep.subr.bf16.mxu1 %v1287_v0  ;;  %v1093_v31 = vld [vmem:[#allocation14 + $0x20] sm:$0xff]  }
 0x141   :  { %1013 = vmatpush3.bf16.msra.mxu1 %v1089_v27 }
 0x1c1   :  { %v379_v54 = vpop.xlane.xlu0 %378 }
 0x1c2   :  { %v383_v55 = vmul.f32 0.03125, %v379_v54 }
 0x1c3   :  { %v382_v56 = vpop.xlane.xlu1 %381 }
 0x1c4   :  { %v385_v57 = vmul.f32 %v383_v55, %v383_v55  ;;  %v384_v58 = vmul.f32 0.03125, %v382_v56  ;;  %v388_v7 = vsub.f32 %v1417_v24, %v383_v55 }
 0x1c5   :  { %v242_v59 = vpop.xlane.xlu0 %241 }
 0x1c6   :  { %v386_v60 = vsub.f32 %v384_v58, %v385_v57  ;;  %v246_v61 = vmul.f32 0.03125, %v242_v59 }
 0x1c7   :  { %v245_v62 = vpop.xlane.xlu1 %244 }
 0x1c8   :  { %v387_v63 = vmax.f32 %v386_v60, 0.0  ;;  %v248_v1 = vmul.f32 %v246_v61, %v246_v61  ;;  %v247_v2 = vmul.f32 0.03125, %v245_v62  ;;  %v251_v12 = vsub.f32 %v1415_v23, %v246_v61 }
 0x1ca   :  { %v389_v3 = vadd.f32 1e-05, %v387_v63  ;;  %v249_v4 = vsub.f32 %v247_v2, %v248_v1 }
 0x1cc   :  { %1098 = vrsqrt.f32 %v389_v3  ;;  %v250_v5 = vmax.f32 %v249_v4, 0.0 }
 0x1ce   :  { %v252_v6 = vadd.f32 1e-05, %v250_v5 }
 0x1d0   :  { %1100 = vrsqrt.f32 %v252_v6 }
 0x1d9   :  { %v1099_v8 = vpop.eup %1098 }
 0x1da   :  { %v391_v10 = vmul.f32 %v1099_v8, %v388_v7 }
 0x1dc   :  { %v397_v13 = vmul.f32 %v854_v9, %v391_v10 }
 0x1dd   :  { %v1101_v14 = vpop.eup %1100 }
 0x1de   :  { %v403_v16 = vadd.f32 %v855_v11, %v397_v13  ;;  %v254_v17 = vmul.f32 %v1101_v14, %v251_v12 }
 0x1e0   :  { %1102 = vtanh.f32 %v403_v16  ;;  %v260_v19 = vmul.f32 %v843_v15, %v254_v17 }
 0x1e2   :  { %v266_v20 = vadd.f32 %v844_v18, %v260_v19 }
 0x1e4   :  { %1104 = vtanh.f32 %v266_v20 }
 0x1ed   :  { %v1103_v21 = vpop.eup %1102 }
 0x1ee   :  { %v899_v22 = vpack.c.bf16 %v1103_v21, %v1103_v21 }
 0x1f0   :  { %582 = vmatprep.mubr.bf16.mxu0 %v899_v22 }
 0x1f1   :  { %v1105_v23 = vpop.eup %1104 }
 0x1f2   :  { %v898_v24 = vpack.c.bf16 %v1105_v23, %v1105_v23 }
 0x1f4   :  { %583 = vmatmul.mubr.bf16.vlgmr.msra.gmra.mxu0 %v898_v24 }
 0x1f5   :  { %1034 = vmatprep.mubr.msk.bf16.mxu0 %vm1288_vm0, %v1287_v0  ;;  %1019 = vmatpush3.bf16.msra.mxu0 %v1090_v28 }
 0x1f6   :  { %1020 = vmatprep.subr.bf16.mxu0 %v1287_v0 }
 0x1f9   :  { %1021 = vmatpush3.bf16.msra.mxu0 %v1091_v29 }
 0x1fa   :  { %1022 = vmatprep.subr.bf16.mxu0 %v1287_v0 }
 0x1fd   :  { %1023 = vmatpush3.bf16.msra.mxu0 %v1092_v30 }
 0x1fe   :  { %1024 = vmatprep.subr.bf16.mxu0 %v1287_v0 }
 0x201   :  { %1025 = vmatpush3.bf16.msra.mxu0 %v1093_v31 }
 0x202   :  { %1026 = vmatprep.subr.bf16.mxu0 %v1287_v0 }
 0x205   :  { %1027 = vmatpush3.bf16.msra.mxu0 %v1094_v32 }
 0x206   :  { %1028 = vmatprep.subr.bf16.mxu0 %v1287_v0 }
 0x209   :  { %1029 = vmatpush3.bf16.msra.mxu0 %v1095_v33 }
 0x20a   :  { %1030 = vmatprep.subr.bf16.mxu0 %v1287_v0 }
 0x20d   :  { %1031 = vmatpush3.bf16.msra.mxu0 %v1096_v43 }
 0x20e   :  { %1032 = vmatprep.subr.bf16.mxu0 %v1287_v0 }
 0x211   :  { %1033 = vmatpush3.bf16.msra.mxu0 %v1097_v44 }
 0x2b4   :  { %v934_v34 = vpop.f32.mrf.mxu0 }
 0x2b6   :  { %v935_v36 = vpop.f32.mrf.mxu0 }
 0x2b7   :  { %v936_v37 = vadd.f32 %v935_v36, %v934_v34 }
 0x2b8   :  { %v937_v38 = vpop.f32.mrf.mxu0 }
 0x2b9   :  { %v585_v39 = vadd.f32 %v936_v37, %v856_v35 }
 0x2ba   :  { %v938_v40 = vpop.f32.mrf.mxu0 }
 0x2bb   :  { %v590_v41 = vmax.f32 %v585_v39, 0.0 }
 0x2bd   :  { %v591_v42 = vpack.c.bf16 %v590_v41, %v590_v41 }
 0x2bf   :  { %1015 = vmatmul.mubr.bf16.vlgmr.msra.gmra.mxu1 %v591_v42 }
 0x37f   :  { %v695_v46 = vpop.f32.mrf.mxu1 }
 0x380   :  { %v696_v47 = vadd.f32 %v875_v45, %v695_v46 }
 0x381   :  { %v1016_v48 = vpop.f32.mrf.mxu1 }
 0x382   :  { %v701_v49 = vmax.f32 %v696_v47, 0.0 }
 0x383   :  { %v698_v50 = vpop.f32.mrf.mxu1 }
 0x384   :  { %v702_v51 = vpack.c.bf16 %v701_v49, %v701_v49 }
 0x385   :  { %v1017_v52 = vpop.f32.mrf.mxu1 }
 0x386   :  { %1035 = vmatmul.mubr.bf16.vlgmr.msra.gmra.mxu0 %v702_v51 }
 0x446   :  { %v808_v54 = vpop.f32.mrf.mxu0 }
 0x447   :  { %v809_v0 = vadd.f32 %v884_v53, %v808_v54 }
 0x448   :  { %v1036_v55 = vpop.f32.mrf.mxu0 }
 0x449   :  { %1106 = vtanh.f32 %v809_v0 }
 0x44a   :  { %v811_v56 = vpop.f32.mrf.mxu0 }
 0x44c   :  { %v1037_v57 = vpop.f32.mrf.mxu0 }
 0x456   :  { %v1107_v58 = vpop.eup %1106 }
 0x457   :  { %815 = vst [vmem:[#allocation15] sm:$0xff] %v1107_v58 }
 0x458   :  { %1259 = shalt.err (!%p1256_p11)
}
 0x459   :  { %825 = dma.vmem_to_hbm [thread:$0]  %s823_s7, 128, %s1479_s11, [#allocation5]  }
 0x45a   :  { %1276 = dma.done.wait [#allocation5], 128  }
 0x45b   :  { %1277 = vsyncadd [#allocation5], 4294967168 }
 0x45c   :  { %829 = vsyncpa [#allocation4], 1 }
 0x45d   :  { %830 = vsyncpa [#allocation7], 1 }
 0x45e   :  { %831 = vsyncpa [#allocation10], 1 }
 0x45f   :  { %832 = vsyncpa [#allocation13], 1 }
 0x460   :  { %833 = vsyncpa [#allocation5], 1 }

</bundles_post_ra>
